<compile_context>
chip_gen: v7x
topology: tpu7x:2x2x1
jax: 0.10.0
libtpu: 0.0.40
codegen_flags: <defaults>
</compile_context>

<pallas_src>
import math

import jax
import jax.numpy as jnp
from jax.experimental import pallas as pl
from jax.experimental.pallas import tpu as pltpu


def _round_up(x, m):
    return ((x + m - 1) // m) * m


# ---------------------------------------------------------------------------
# Fused kernel: BN(x) -> fc1 (all branches concatenated) -> per-branch fc2
# ---------------------------------------------------------------------------
def _idenet_kernel(x_ref, w1_ref, b1_ref, w2_ref, b2_ref, score_ref, feat_ref):
    eps = 1e-5
    x = x_ref[...].astype(jnp.float32)                       # (B, F)

    # --- BatchNorm1d (training mode: batch stats, biased variance) ----------
    mean = jnp.mean(x, axis=0, keepdims=True)                 # (1, F)
    xc = x - mean
    var = jnp.mean(xc * xc, axis=0, keepdims=True)            # (1, F)
    xn = xc * jax.lax.rsqrt(var + eps)                        # gamma=1, beta=0

    # --- fc1 for ALL branches at once: (B, F) @ (F, NB*H), f32 accumulate ----
    h = jnp.dot(xn.astype(jnp.bfloat16), w1_ref[...],
                preferred_element_type=jnp.float32)
    h = h + b1_ref[...].astype(jnp.float32)                   # (B, NB*H)
    feat_ref[...] = h.astype(feat_ref.dtype)                  # lane-dense write

    # --- per-branch fc2: (B, H) @ (H, Cpad), f32 activations & weights -------
    nb, hdim, _ = w2_ref.shape
    for b in range(nb):                                       # static, nb in {1, 2}
        hb = h[:, b * hdim:(b + 1) * hdim]                    # (B, H) f32
        s = jnp.dot(hb, w2_ref[b].astype(jnp.float32),
                    preferred_element_type=jnp.float32)
        s = s + b2_ref[b].astype(jnp.float32)                 # (B, Cpad)
        score_ref[b] = s.astype(score_ref.dtype)


@jax.jit
def _run_fused(x, w1cat, b1cat, w2s, b2s):
    """One pallas_call for NB branches sharing BN and a concatenated fc1.

    x     : (B, F)        f32
    w1cat : (F, NB*H)     bf16   b1cat : (1, NB*H)  f32
    w2s   : (NB, H, Cpad) bf16   b2s   : (NB, 1, Cpad) f32
    returns scores (NB, B, Cpad) f32, feats (B, NB*H) f32
    """
    B, F = x.shape
    NBH = w1cat.shape[1]
    NB, H, Cp = w2s.shape

    scores, feats = pl.pallas_call(
        _idenet_kernel,
        out_shape=(
            jax.ShapeDtypeStruct((NB, B, Cp), jnp.float32),
            jax.ShapeDtypeStruct((B, NBH), jnp.float32),
        ),
        grid=(1,),
        in_specs=[
            pl.BlockSpec((B, F), lambda i: (0, 0)),            # x
            pl.BlockSpec((F, NBH), lambda i: (0, 0)),          # W1 (concat branches)
            pl.BlockSpec((1, NBH), lambda i: (0, 0)),          # b1
            pl.BlockSpec((NB, H, Cp), lambda i: (0, 0, 0)),    # W2 stacked
            pl.BlockSpec((NB, 1, Cp), lambda i: (0, 0, 0)),    # b2 stacked
        ],
        out_specs=(
            pl.BlockSpec((NB, B, Cp), lambda i: (0, 0, 0)),    # scores (lane-padded)
            pl.BlockSpec((B, NBH), lambda i: (0, 0)),          # feats
        ),
        compiler_params=pltpu.CompilerParams(
            dimension_semantics=("arbitrary",),
            vmem_limit_bytes=32 << 20,                         # right-sized for v7x too
        ),
    )(x, w1cat, b1cat, w2s, b2s)
    return scores, feats


# ---------------------------------------------------------------------------
# Parameter init (mirrors weights_init_kaiming): Linear weights kaiming_normal
# with mode='fan_out' (std = sqrt(2/out_features)), biases 0.  Stored already
# transposed to (in, out), bf16, with the class dim zero-padded to 128 lanes.
# ---------------------------------------------------------------------------
def _kaiming_linear_t(key, in_features, out_features, out_pad):
    std = math.sqrt(2.0 / out_features)
    w_t = std * jax.random.normal(key, (in_features, out_features), jnp.float32)
    w_t = jnp.pad(w_t, ((0, 0), (0, out_pad - out_features)))
    b = jnp.zeros((1, out_pad), jnp.float32)
    return w_t.astype(jnp.bfloat16), b


def init_idenet_params(key, in_planes, num_classes, hidden=512):
    c_pad = _round_up(num_classes, 128)
    keys = jax.random.split(key, 4)
    rgb_w1, rgb_b1 = _kaiming_linear_t(keys[0], in_planes, hidden, hidden)
    rgb_w2, rgb_b2 = _kaiming_linear_t(keys[1], hidden, num_classes, c_pad)
    ir_w1, ir_b1 = _kaiming_linear_t(keys[2], in_planes, hidden, hidden)
    ir_w2, ir_b2 = _kaiming_linear_t(keys[3], hidden, num_classes, c_pad)
    return {
        # fc1 concatenated along output columns: [:, :H] = rgb, [:, H:] = ir
        "w1cat": jnp.concatenate([rgb_w1, ir_w1], axis=1),   # (F, 2H)  bf16
        "b1cat": jnp.concatenate([rgb_b1, ir_b1], axis=1),   # (1, 2H)  f32
        "w2": jnp.stack([rgb_w2, ir_w2]),                    # (2, H, Cpad) bf16
        "b2": jnp.stack([rgb_b2, ir_b2]),                    # (2, 1, Cpad) f32
        "hidden": hidden,
        "num_classes": num_classes,
    }


def idenet_forward(params, x, stage="fix"):
    """Pallas implementation of IDENet.forward."""
    w1cat, b1cat = params["w1cat"], params["b1cat"]
    w2, b2 = params["w2"], params["b2"]
    H, C = params["hidden"], params["num_classes"]

    if stage == "fix":
        scores, feats = _run_fused(x, w1cat, b1cat, w2, b2)
        rgb_score, ir_score = scores[0, :, :C], scores[1, :, :C]
        rgb_x, ir_x = feats[:, :H], feats[:, H:]
        return [rgb_score, rgb_x, ir_score, ir_x]
    elif stage == "train_rgb":
        scores, feats = _run_fused(x, w1cat[:, :H], b1cat[:, :H], w2[:1], b2[:1])
        return (scores[0, :, :C], feats)
    elif stage == "train_ir":
        scores, feats = _run_fused(x, w1cat[:, H:], b1cat[:, H:], w2[1:], b2[1:])
        return (scores[0, :, :C], feats)


# ---------------------------------------------------------------------------
# Pure-JAX reference mirroring the kernel's precision choices exactly
# (bf16 fc1 inputs, f32 fc2), so the check is order-of-summation noise only.
# ---------------------------------------------------------------------------
def _branch_ref(x, w1_t, b1, w2_t, b2):
    eps = 1e-5
    mean = jnp.mean(x, axis=0, keepdims=True)
    xc = x - mean
    var = jnp.mean(xc * xc, axis=0, keepdims=True)
    xn = xc * jax.lax.rsqrt(var + eps)
    h = jnp.dot(xn.astype(jnp.bfloat16), w1_t,
                preferred_element_type=jnp.float32) + b1
    s = jnp.dot(h, w2_t.astype(jnp.float32),
                preferred_element_type=jnp.float32) + b2
    return s, h


if __name__ == "__main__":
    # Small shapes consistent with the module: hidden stays 512 (hard-coded in
    # IDENet.__init__), num_classes=395 (module default, exercises lane padding),
    # a reduced in_planes keeps the test quick.
    B, IN_PLANES, HIDDEN, NUM_CLASSES = 8, 256, 512, 395

    key = jax.random.PRNGKey(0)
    kx, kp = jax.random.split(key)
    x = jax.random.normal(kx, (B, IN_PLANES), jnp.float32)
    params = init_idenet_params(kp, IN_PLANES, NUM_CLASSES, HIDDEN)

    # stage='fix': both branches fused in one kernel invocation.
    rgb_score, rgb_x, ir_score, ir_x = jax.block_until_ready(
        idenet_forward(params, x, stage="fix"))

    # stage='train_rgb' / 'train_ir': single-branch path.
    tr_score, tr_x = jax.block_until_ready(idenet_forward(params, x, stage="train_rgb"))
    ti_score, ti_x = jax.block_until_ready(idenet_forward(params, x, stage="train_ir"))

    # References (same precision policy as the kernel).
    ref_rgb_score, ref_rgb_x = _branch_ref(
        x, params["w1cat"][:, :HIDDEN], params["b1cat"][:, :HIDDEN],
        params["w2"][0, :, :NUM_CLASSES], params["b2"][0, :, :NUM_CLASSES])
    ref_ir_score, ref_ir_x = _branch_ref(
        x, params["w1cat"][:, HIDDEN:], params["b1cat"][:, HIDDEN:],
        params["w2"][1, :, :NUM_CLASSES], params["b2"][1, :, :NUM_CLASSES])

    assert rgb_score.shape == (B, NUM_CLASSES) and rgb_x.shape == (B, HIDDEN)
    assert ir_score.shape == (B, NUM_CLASSES) and ir_x.shape == (B, HIDDEN)
    assert tr_score.shape == (B, NUM_CLASSES) and tr_x.shape == (B, HIDDEN)
    assert ti_score.shape == (B, NUM_CLASSES) and ti_x.shape == (B, HIDDEN)

    tol = dict(atol=1e-2, rtol=1e-2)
    assert jnp.allclose(rgb_score, ref_rgb_score, **tol)
    assert jnp.allclose(rgb_x, ref_rgb_x, **tol)
    assert jnp.allclose(ir_score, ref_ir_score, **tol)
    assert jnp.allclose(ir_x, ref_ir_x, **tol)
    assert jnp.allclose(tr_score, rgb_score, **tol) and jnp.allclose(tr_x, rgb_x, **tol)
    assert jnp.allclose(ti_score, ir_score, **tol) and jnp.allclose(ti_x, ir_x, **tol)

    print("KERNEL_OK")
</pallas_src>

<mosaic_0001>
module attributes {stable_mosaic.version = 11 : i64} {
  func.func @_idenet_kernel(%arg0: i32, %arg1: memref<8x256xf32, #tpu.memory_space<vmem>>, %arg2: memref<256x1024xbf16, #tpu.memory_space<vmem>>, %arg3: memref<1x1024xf32, #tpu.memory_space<vmem>>, %arg4: memref<2x512x512xbf16, #tpu.memory_space<vmem>>, %arg5: memref<2x1x512xf32, #tpu.memory_space<vmem>>, %arg6: memref<2x8x512xf32, #tpu.memory_space<vmem>>, %arg7: memref<8x1024xf32, #tpu.memory_space<vmem>>) attributes {dimension_semantics = [#tpu.dimension_semantics<arbitrary>], iteration_bounds = array<i64: 1>, scalar_prefetch = 0 : i64, scratch_operands = 0 : i64, tpu.core_type = #tpu.core_type<tc>, window_params = [{pipeline_mode = #tpu.pipeline_mode<synchronous>, transform_indices = @transform_0, window_bounds = array<i64: 8, 256>}, {pipeline_mode = #tpu.pipeline_mode<synchronous>, transform_indices = @transform_1, window_bounds = array<i64: 256, 1024>}, {pipeline_mode = #tpu.pipeline_mode<synchronous>, transform_indices = @transform_2, window_bounds = array<i64: 1, 1024>}, {pipeline_mode = #tpu.pipeline_mode<synchronous>, transform_indices = @transform_3, window_bounds = array<i64: 2, 512, 512>}, {pipeline_mode = #tpu.pipeline_mode<synchronous>, transform_indices = @transform_4, window_bounds = array<i64: 2, 1, 512>}, {pipeline_mode = #tpu.pipeline_mode<synchronous>, transform_indices = @transform_5, window_bounds = array<i64: 2, 8, 512>}, {pipeline_mode = #tpu.pipeline_mode<synchronous>, transform_indices = @transform_6, window_bounds = array<i64: 8, 1024>}]} {
    %c0 = arith.constant 0 : index
    %c0_0 = arith.constant 0 : index
    %0 = vector.load %arg1[%c0, %c0_0] : memref<8x256xf32, #tpu.memory_space<vmem>>, vector<8x256xf32>
    %cst = arith.constant dense<0.000000e+00> : vector<256xf32>
    %1 = vector.multi_reduction <add>, %0, %cst [0] : vector<8x256xf32> to vector<256xf32>
    %2 = vector.shape_cast %1 : vector<256xf32> to vector<1x256xf32>
    %cst_1 = arith.constant 8.000000e+00 : f32
    %3 = vector.broadcast %cst_1 : f32 to vector<1x256xf32>
    %4 = arith.divf %2, %3 : vector<1x256xf32>
    %5 = vector.broadcast %4 : vector<1x256xf32> to vector<8x256xf32>
    %6 = arith.subf %0, %5 : vector<8x256xf32>
    %7 = arith.mulf %6, %6 : vector<8x256xf32>
    %cst_2 = arith.constant dense<0.000000e+00> : vector<256xf32>
    %8 = vector.multi_reduction <add>, %7, %cst_2 [0] : vector<8x256xf32> to vector<256xf32>
    %9 = vector.shape_cast %8 : vector<256xf32> to vector<1x256xf32>
    %cst_3 = arith.constant 8.000000e+00 : f32
    %10 = vector.broadcast %cst_3 : f32 to vector<1x256xf32>
    %11 = arith.divf %9, %10 : vector<1x256xf32>
    %cst_4 = arith.constant 9.99999974E-6 : f32
    %12 = vector.broadcast %cst_4 : f32 to vector<1x256xf32>
    %13 = arith.addf %11, %12 : vector<1x256xf32>
    %14 = math.rsqrt %13 : vector<1x256xf32>
    %15 = vector.broadcast %14 : vector<1x256xf32> to vector<8x256xf32>
    %16 = arith.mulf %6, %15 : vector<8x256xf32>
    %17 = arith.truncf %16 : vector<8x256xf32> to vector<8x256xbf16>
    %c0_5 = arith.constant 0 : index
    %c0_6 = arith.constant 0 : index
    %18 = vector.load %arg2[%c0_5, %c0_6] : memref<256x1024xbf16, #tpu.memory_space<vmem>>, vector<256x1024xbf16>
    %cst_7 = arith.constant dense<0.000000e+00> : vector<8x1024xf32>
    %19 = tpu.matmul %17, %18, %cst_7 {dimension_numbers = #tpu.dot_dimension_numbers<[1], [0], [0], [1], [0, 0, 1, 1], [], []>} : vector<8x256xbf16>, vector<256x1024xbf16>, vector<8x1024xf32> -> vector<8x1024xf32>
    %c0_8 = arith.constant 0 : index
    %c0_9 = arith.constant 0 : index
    %20 = vector.load %arg3[%c0_8, %c0_9] : memref<1x1024xf32, #tpu.memory_space<vmem>>, vector<1x1024xf32>
    %21 = vector.broadcast %20 : vector<1x1024xf32> to vector<8x1024xf32>
    %22 = arith.addf %19, %21 : vector<8x1024xf32>
    %c0_10 = arith.constant 0 : index
    %c0_11 = arith.constant 0 : index
    %23 = vector.load %arg7[%c0_10, %c0_11] : memref<8x1024xf32, #tpu.memory_space<vmem>>, vector<8x1024xf32>
    tpu.vector_store %arg7[%c0_10, %c0_11], %22 {strides = array<i32>} : memref<8x1024xf32, #tpu.memory_space<vmem>>, vector<8x1024xf32>,
    %24 = vector.extract_strided_slice %22 {offsets = [0, 0], sizes = [8, 512], strides = [1, 1]} : vector<8x1024xf32> to vector<8x512xf32>
    %c0_12 = arith.constant 0 : index
    %c0_13 = arith.constant 0 : index
    %c0_14 = arith.constant 0 : index
    %25 = vector.load %arg4[%c0_12, %c0_13, %c0_14] : memref<2x512x512xbf16, #tpu.memory_space<vmem>>, vector<1x512x512xbf16>
    %26 = vector.shape_cast %25 : vector<1x512x512xbf16> to vector<512x512xbf16>
    %27 = arith.extf %26 : vector<512x512xbf16> to vector<512x512xf32>
    %cst_15 = arith.constant dense<0.000000e+00> : vector<8x512xf32>
    %28 = tpu.matmul %24, %27, %cst_15 {dimension_numbers = #tpu.dot_dimension_numbers<[1], [0], [0], [1], [0, 0, 1, 1], [], []>} : vector<8x512xf32>, vector<512x512xf32>, vector<8x512xf32> -> vector<8x512xf32>
    %c0_16 = arith.constant 0 : index
    %c0_17 = arith.constant 0 : index
    %c0_18 = arith.constant 0 : index
    %29 = vector.load %arg5[%c0_16, %c0_17, %c0_18] : memref<2x1x512xf32, #tpu.memory_space<vmem>>, vector<1x1x512xf32>
    %30 = vector.shape_cast %29 : vector<1x1x512xf32> to vector<1x512xf32>
    %31 = vector.broadcast %30 : vector<1x512xf32> to vector<8x512xf32>
    %32 = arith.addf %28, %31 : vector<8x512xf32>
    %c0_19 = arith.constant 0 : index
    %c0_20 = arith.constant 0 : index
    %c0_21 = arith.constant 0 : index
    %33 = vector.load %arg6[%c0_19, %c0_20, %c0_21] : memref<2x8x512xf32, #tpu.memory_space<vmem>>, vector<1x8x512xf32>
    %34 = vector.shape_cast %33 : vector<1x8x512xf32> to vector<8x512xf32>
    %35 = vector.shape_cast %32 : vector<8x512xf32> to vector<1x8x512xf32>
    tpu.vector_store %arg6[%c0_19, %c0_20, %c0_21], %35 {strides = array<i32>} : memref<2x8x512xf32, #tpu.memory_space<vmem>>, vector<1x8x512xf32>,
    %36 = vector.extract_strided_slice %22 {offsets = [0, 512], sizes = [8, 512], strides = [1, 1]} : vector<8x1024xf32> to vector<8x512xf32>
    %c1 = arith.constant 1 : index
    %c0_22 = arith.constant 0 : index
    %c0_23 = arith.constant 0 : index
    %37 = vector.load %arg4[%c1, %c0_22, %c0_23] : memref<2x512x512xbf16, #tpu.memory_space<vmem>>, vector<1x512x512xbf16>
    %38 = vector.shape_cast %37 : vector<1x512x512xbf16> to vector<512x512xbf16>
    %39 = arith.extf %38 : vector<512x512xbf16> to vector<512x512xf32>
    %cst_24 = arith.constant dense<0.000000e+00> : vector<8x512xf32>
    %40 = tpu.matmul %36, %39, %cst_24 {dimension_numbers = #tpu.dot_dimension_numbers<[1], [0], [0], [1], [0, 0, 1, 1], [], []>} : vector<8x512xf32>, vector<512x512xf32>, vector<8x512xf32> -> vector<8x512xf32>
    %c1_25 = arith.constant 1 : index
    %c0_26 = arith.constant 0 : index
    %c0_27 = arith.constant 0 : index
    %41 = vector.load %arg5[%c1_25, %c0_26, %c0_27] : memref<2x1x512xf32, #tpu.memory_space<vmem>>, vector<1x1x512xf32>
    %42 = vector.shape_cast %41 : vector<1x1x512xf32> to vector<1x512xf32>
    %43 = vector.broadcast %42 : vector<1x512xf32> to vector<8x512xf32>
    %44 = arith.addf %40, %43 : vector<8x512xf32>
    %c1_28 = arith.constant 1 : index
    %c0_29 = arith.constant 0 : index
    %c0_30 = arith.constant 0 : index
    %45 = vector.load %arg6[%c1_28, %c0_29, %c0_30] : memref<2x8x512xf32, #tpu.memory_space<vmem>>, vector<1x8x512xf32>
    %46 = vector.shape_cast %45 : vector<1x8x512xf32> to vector<8x512xf32>
    %47 = vector.shape_cast %44 : vector<8x512xf32> to vector<1x8x512xf32>
    tpu.vector_store %arg6[%c1_28, %c0_29, %c0_30], %47 {strides = array<i32>} : memref<2x8x512xf32, #tpu.memory_space<vmem>>, vector<1x8x512xf32>,
    return
  }
  func.func @transform_0(%arg0: i32) -> (i32, i32) {
    %c0_i32 = arith.constant 0 : i32
    %c0_i32_0 = arith.constant 0 : i32
    %c0_i32_1 = arith.constant 0 : i32
    return %c0_i32, %c0_i32_0 : i32, i32
  }
  func.func @transform_1(%arg0: i32) -> (i32, i32) {
    %c0_i32 = arith.constant 0 : i32
    %c0_i32_0 = arith.constant 0 : i32
    %c0_i32_1 = arith.constant 0 : i32
    return %c0_i32, %c0_i32_0 : i32, i32
  }
  func.func @transform_2(%arg0: i32) -> (i32, i32) {
    %c0_i32 = arith.constant 0 : i32
    %c0_i32_0 = arith.constant 0 : i32
    %c0_i32_1 = arith.constant 0 : i32
    return %c0_i32, %c0_i32_0 : i32, i32
  }
  func.func @transform_3(%arg0: i32) -> (i32, i32, i32) {
    %c0_i32 = arith.constant 0 : i32
    %c0_i32_0 = arith.constant 0 : i32
    %c0_i32_1 = arith.constant 0 : i32
    %c0_i32_2 = arith.constant 0 : i32
    return %c0_i32, %c0_i32_0, %c0_i32_1 : i32, i32, i32
  }
  func.func @transform_4(%arg0: i32) -> (i32, i32, i32) {
    %c0_i32 = arith.constant 0 : i32
    %c0_i32_0 = arith.constant 0 : i32
    %c0_i32_1 = arith.constant 0 : i32
    %c0_i32_2 = arith.constant 0 : i32
    return %c0_i32, %c0_i32_0, %c0_i32_1 : i32, i32, i32
  }
  func.func @transform_5(%arg0: i32) -> (i32, i32, i32) {
    %c0_i32 = arith.constant 0 : i32
    %c0_i32_0 = arith.constant 0 : i32
    %c0_i32_1 = arith.constant 0 : i32
    %c0_i32_2 = arith.constant 0 : i32
    return %c0_i32, %c0_i32_0, %c0_i32_1 : i32, i32, i32
  }
  func.func @transform_6(%arg0: i32) -> (i32, i32) {
    %c0_i32 = arith.constant 0 : i32
    %c0_i32_0 = arith.constant 0 : i32
    %c0_i32_1 = arith.constant 0 : i32
    return %c0_i32, %c0_i32_0 : i32, i32
  }
}

</mosaic_0001>

<bundles_post_ra>
// kernel: _run_fused.1
= control target key start
LH: loop header
LB: loop body
LE: loop exit
PB: predicated region body
PF: predicated region fallthrough
CT: control target
= control target key end

     0   :  { %12 = vsyncpa [#allocation3], 0  ;;  %s4198_s0 = inlined_call_operand.hbm [shape: f32[8,256], index: 0, kind: input, shape index: {}]   ;;  %s4199_s1 = inlined_call_operand.hbm [shape: bf16[256,1024], index: 1, kind: input, shape index: {}]   ;;  %s4200_s2 = inlined_call_operand.hbm [shape: f32[1,1024], index: 2, kind: input, shape index: {}]   ;;  %s4201_s3 = inlined_call_operand.hbm [shape: bf16[2,512,512], index: 3, kind: input, shape index: {}]   ;;  %s4202_s4 = inlined_call_operand.vmem [shape: f32[2,1,512], index: 4, kind: input, shape index: {}]   ;;  %s4203_s5 = inlined_call_operand.hbm [shape: f32[2,8,512], index: 5, kind: output, shape index: {0}]   ;;  %s4204_s6 = inlined_call_operand.hbm [shape: f32[8,1024], index: 6, kind: output, shape index: {1}]  }
   0x1   :  { %13 = vsyncpa [#allocation6], 0 }
   0x2   :  { %14 = vsyncpa [#allocation9], 0 }
   0x3   :  { %15 = vsyncpa [#allocation4], 0 }
   0x4   :  { %16 = vsyncpa [#allocation12], 0  ;;  %s3977_s21 = smov [#allocation5]   ;;  %s3835_s25 = scalar_lea.hbm %s4199_s1, 16384 }
   0x5   :  { %s32_s22 = sshll.u32 %s3977_s21, 4  ;;  %p3836_p0 = scmp.ne.s32.totalorder %s4199_s1, %s3835_s25  ;;  %s33_s22 = int_to_ptr.vmem [resolvable:$true] %s32_s22 }
   0x6   :  { %p3839_p1 = scmp.lt.u32.totalorder %s3835_s25, %s4199_s1 }
   0x8   :  { %p3841_p2 = pnand %p3839_p1, %p3836_p0 }
   0xa   :  { %3844 = shalt.err (!%p3841_p2)
}
   0xb   :  { %s3845_s30 = scalar_lea.vmem %s33_s22, 16384  ;;  %p3850_p4 = scmp.lt.s32.totalorder %s33_s22, %s33_s22 }
   0xc   :  { %p3846_p3 = scmp.ne.s32.totalorder %s33_s22, %s3845_s30  ;;  %p3851_p5 = scmp.lt.s32.totalorder %s3845_s30, %s3845_s30 }
   0xe   :  { %p3852_p6 = por %p3851_p5, %p3850_p4 }
  0x10   :  { %p3853_p7 = pnand %p3852_p6, %p3846_p3 }
  0x12   :  { %3856 = shalt.err (!%p3853_p7)
}
  0x13   :  { %s3978_s7 = smov 512   ;;  %s3979_s8 = smov 32  }
  0x14   :  { %38 = dma.hbm_to_vmem [thread:$0]  %s4199_s1, 16384, %s33_s22, [#allocation6], %s3978_s7, %s3978_s7, %s3979_s8  }
  0x15   :  { %s3980_s11 = smov [#allocation2]   ;;  %s3981_s13 = smov [#allocation7]  }
  0x16   :  { %s23_s12 = sshll.u32 %s3980_s11, 4  ;;  %s45_s14 = sshll.u32 %s3981_s13, 4  ;;  %s24_s12 = int_to_ptr.vmem [resolvable:$true] %s23_s12  ;;  %s46_s14 = int_to_ptr.vmem [resolvable:$true] %s45_s14 }
  0x17   :  { %s3857_s17 = scalar_lea.hbm %s4198_s0, 256 }
  0x18   :  { %p3858_p8 = scmp.ne.s32.totalorder %s4198_s0, %s3857_s17  ;;  %p3861_p9 = scmp.lt.u32.totalorder %s3857_s17, %s4198_s0 }
  0x1a   :  { %p3863_p10 = pnand %p3861_p9, %p3858_p8 }
  0x1c   :  { %3866 = shalt.err (!%p3863_p10)
}
  0x1d   :  { %s3867_s1 = scalar_lea.vmem %s24_s12, 256  ;;  %p3872_p12 = scmp.lt.s32.totalorder %s24_s12, %s24_s12 }
  0x1e   :  { %p3868_p11 = scmp.ne.s32.totalorder %s24_s12, %s3867_s1  ;;  %p3873_p13 = scmp.lt.s32.totalorder %s3867_s1, %s3867_s1 }
  0x20   :  { %p3874_p0 = por %p3873_p13, %p3872_p12 }
  0x22   :  { %p3875_p1 = pnand %p3874_p0, %p3868_p11 }
  0x24   :  { %3878 = shalt.err (!%p3875_p1)
}
  0x25   :  { %26 = dma.hbm_to_vmem [thread:$0]  %s4198_s0, 256, %s24_s12, [#allocation3]  }
  0x26   :  { %s3879_s26 = scalar_lea.hbm %s4200_s2, 128 }
  0x27   :  { %p3880_p2 = scmp.ne.s32.totalorder %s4200_s2, %s3879_s26  ;;  %p3883_p3 = scmp.lt.u32.totalorder %s3879_s26, %s4200_s2 }
  0x29   :  { %p3885_p4 = pnand %p3883_p3, %p3880_p2 }
  0x2b   :  { %3888 = shalt.err (!%p3885_p4)
}
  0x2c   :  { %s3889_s9 = scalar_lea.vmem %s46_s14, 128  ;;  %p3894_p6 = scmp.lt.s32.totalorder %s46_s14, %s46_s14 }
  0x2d   :  { %p3890_p5 = scmp.ne.s32.totalorder %s46_s14, %s3889_s9  ;;  %p3895_p7 = scmp.lt.s32.totalorder %s3889_s9, %s3889_s9 }
  0x2f   :  { %p3896_p8 = por %p3895_p7, %p3894_p6 }
  0x31   :  { %p3897_p9 = pnand %p3896_p8, %p3890_p5 }
  0x33   :  { %3900 = shalt.err (!%p3897_p9)
}
  0x34   :  { %48 = dma.hbm_to_vmem [thread:$0]  %s4200_s2, 128, %s46_s14, [#allocation6]  }
  0x35   :  { %s3982_s11 = smov [#allocation8]   ;;  %s3901_s16 = scalar_lea.hbm %s4201_s3, 32768 }
  0x36   :  { %s54_s12 = sshll.u32 %s3982_s11, 4  ;;  %p3902_p10 = scmp.ne.s32.totalorder %s4201_s3, %s3901_s16  ;;  %s55_s12 = int_to_ptr.vmem [resolvable:$true] %s54_s12 }
  0x37   :  { %p3905_p11 = scmp.lt.u32.totalorder %s3901_s16, %s4201_s3 }
  0x39   :  { %p3907_p12 = pnand %p3905_p11, %p3902_p10 }
  0x3b   :  { %3910 = shalt.err (!%p3907_p12)
}
  0x3c   :  { %s3911_s21 = scalar_lea.vmem %s55_s12, 32768  ;;  %p3916_p0 = scmp.lt.s32.totalorder %s55_s12, %s55_s12 }
  0x3d   :  { %p3912_p13 = scmp.ne.s32.totalorder %s55_s12, %s3911_s21  ;;  %p3917_p1 = scmp.lt.s32.totalorder %s3911_s21, %s3911_s21 }
  0x3f   :  { %p3918_p2 = por %p3917_p1, %p3916_p0 }
  0x41   :  { %p3919_p3 = pnand %p3918_p2, %p3912_p13 }
  0x43   :  { %3922 = shalt.err (!%p3919_p3)
}
  0x44   :  { %s3983_s2 = smov 256   ;;  %s3984_s14 = smov 16  }
  0x45   :  { %60 = dma.hbm_to_vmem [thread:$0]  %s4201_s3, 32768, %s55_s12, [#allocation9], %s3983_s2, %s3983_s2, %s3984_s14  }
  0x46   :  { %3967 = dma.done.wait [#allocation3], 256  }
  0x47   :  { %3968 = vsyncadd [#allocation3], 4294967040 }
  0x48   :  { %3969 = dma.done.wait [#allocation6], 16512  }
  0x49   :  { %3970 = vsyncadd [#allocation6], 4294950784 }
  0x4a   :  { %3971 = dma.done.wait [#allocation9], 32768  }
  0x4b   :  { %3972 = vsyncadd [#allocation9], 4294934528  ;;  %v118_v0 = vld [vmem:[#allocation5] sm:$0xff]  ;;  %v119_v17 = vld [vmem:[#allocation5 + $0x8] sm:$0xff]  ;;  %s3985_s24 = smov [#allocation11]  }
  0x4c   :  { %v122_v1 = vld [vmem:[#allocation5 + $0x20] sm:$0xff]  ;;  %v123_v19 = vld [vmem:[#allocation5 + $0x28] sm:$0xff]  ;;  %v4073_v20 = vld [vmem:[#allocation2 + $0x8] sm:$0xff]  ;;  %s2509_s25 = sshll.u32 %s3985_s24, 4  ;;  %s2510_s25 = int_to_ptr.vmem [resolvable:$true] %s2509_s25 }
  0x4d   :  { %v126_v2 = vld [vmem:[#allocation5 + $0x40] sm:$0xff]  ;;  %v2525_v3 = vcombine.high %v118_v0, %v122_v1  ;;  %v2524_v4 = vcombine.low %v118_v0, %v122_v1  ;;  %v4075_v21 = vld [vmem:[#allocation2] sm:$0xff]  ;;  %v2527_v22 = vcombine.high %v119_v17, %v123_v19  ;;  %v2526_v23 = vcombine.low %v119_v17, %v123_v19  ;;  %v127_v26 = vld [vmem:[#allocation5 + $0x48] sm:$0xff]  ;;  %s3923_s26 = scalar_lea.vmem %s2510_s25, 1024  ;;  %p3928_p5 = scmp.lt.s32.totalorder %s2510_s25, %s2510_s25 }
  0x4e   :  { %v130_v5 = vld [vmem:[#allocation5 + $0x60] sm:$0xff]  ;;  %v83_v24 = vrot.slane %v4073_v20, 4  ;;  %v77_v25 = vrot.slane %v4075_v21, 4  ;;  %v131_v27 = vld [vmem:[#allocation5 + $0x68] sm:$0xff]  ;;  %p3924_p4 = scmp.ne.s32.totalorder %s2510_s25, %s3923_s26  ;;  %p3929_p6 = scmp.lt.s32.totalorder %s3923_s26, %s3923_s26 }
  0x4f   :  { %v2533_v6 = vcombine.high %v126_v2, %v130_v5  ;;  %v134_v7 = vld [vmem:[#allocation5 + $0x80] sm:$0xff]  ;;  %928 = vmatprep.subr.bf16.mxu0 %v2525_v3  ;;  %v2532_v9 = vcombine.low %v126_v2, %v130_v5  ;;  %v2535_v29 = vcombine.high %v127_v26, %v131_v27  ;;  %v135_v30 = vld [vmem:[#allocation5 + $0x88] sm:$0xff]  ;;  %969 = vmatprep.subr.bf16.mxu1 %v2527_v22 }
  0x50   :  { %v138_v8 = vld [vmem:[#allocation5 + $0xa0] sm:$0xff]  ;;  %929 = vmatpush1.bf16.msra.mxu0 %v2524_v4  ;;  %v139_v31 = vld [vmem:[#allocation5 + $0xa8] sm:$0xff]  ;;  %v84_v34 = vadd.f32 %v83_v24, %v4073_v20  ;;  %v78_v35 = vadd.f32 %v77_v25, %v4075_v21  ;;  %970 = vmatpush1.bf16.msra.mxu1 %v2526_v23  ;;  %v2534_v36 = vcombine.low %v127_v26, %v131_v27  ;;  %p3930_p7 = por %p3929_p6, %p3928_p5 }
  0x51   :  { %930 = vmatprep.subr.bf16.mxu0 %v2533_v6  ;;  %v2541_v10 = vcombine.high %v134_v7, %v138_v8  ;;  %v142_v11 = vld [vmem:[#allocation5 + $0xc0] sm:$0xff]  ;;  %v2540_v13 = vcombine.low %v134_v7, %v138_v8  ;;  %971 = vmatprep.subr.bf16.mxu1 %v2535_v29  ;;  %v2543_v40 = vcombine.high %v135_v30, %v139_v31  ;;  %v143_v42 = vld [vmem:[#allocation5 + $0xc8] sm:$0xff] }
  0x52   :  { %v146_v12 = vld [vmem:[#allocation5 + $0xe0] sm:$0xff]  ;;  %v85_v38 = vrot.slane %v84_v34, 2  ;;  %v79_v39 = vrot.slane %v78_v35, 2  ;;  %v147_v43 = vld [vmem:[#allocation5 + $0xe8] sm:$0xff]  ;;  %v2542_v48 = vcombine.low %v135_v30, %v139_v31  ;;  %p3931_p8 = pnand %p3930_p7, %p3924_p4 }
  0x53   :  { %v2549_v14 = vcombine.high %v142_v11, %v146_v12  ;;  %v150_v15 = vld [vmem:[#allocation5 + $0x100] sm:$0xff]  ;;  %v2548_v18 = vcombine.low %v142_v11, %v146_v12  ;;  %v2551_v52 = vcombine.high %v143_v42, %v147_v43  ;;  %v151_v54 = vld [vmem:[#allocation5 + $0x108] sm:$0xff]  ;;  %v2550_v60 = vcombine.low %v143_v42, %v147_v43 }
  0x54   :  { %931 = vmatpush1.bf16.msra.mxu0 %v2532_v9  ;;  %v154_v16 = vld [vmem:[#allocation5 + $0x120] sm:$0xff]  ;;  %v86_v46 = vadd.f32 %v85_v38, %v84_v34  ;;  %v80_v47 = vadd.f32 %v79_v39, %v78_v35  ;;  %972 = vmatpush1.bf16.msra.mxu1 %v2534_v36  ;;  %v155_v55 = vld [vmem:[#allocation5 + $0x128] sm:$0xff] }
  0x55   :  { %932 = vmatprep.subr.bf16.mxu0 %v2541_v10  ;;  %v2557_v28 = vcombine.high %v150_v15, %v154_v16  ;;  %v158_v32 = vld [vmem:[#allocation5 + $0x140] sm:$0xff]  ;;  %v2556_v37 = vcombine.low %v150_v15, %v154_v16  ;;  %973 = vmatprep.subr.bf16.mxu1 %v2543_v40  ;;  %v2559_v0 = vcombine.high %v151_v54, %v155_v55  ;;  %v159_v2 = vld [vmem:[#allocation5 + $0x148] sm:$0xff] }
  0x56   :  { %v162_v33 = vld [vmem:[#allocation5 + $0x160] sm:$0xff]  ;;  %v87_v50 = vrot.slane %v86_v46, 1  ;;  %v81_v51 = vrot.slane %v80_v47, 1  ;;  %v163_v3 = vld [vmem:[#allocation5 + $0x168] sm:$0xff]  ;;  %v2558_v9 = vcombine.low %v151_v54, %v155_v55 }
  0x57   :  { %v2565_v41 = vcombine.high %v158_v32, %v162_v33  ;;  %v166_v44 = vld [vmem:[#allocation5 + $0x180] sm:$0xff]  ;;  %v2564_v49 = vcombine.low %v158_v32, %v162_v33  ;;  %v2567_v12 = vcombine.high %v159_v2, %v163_v3  ;;  %v171_v15 = vld [vmem:[#allocation5 + $0x1a8] sm:$0xff] }
  0x58   :  { %933 = vmatpush1.bf16.msra.mxu0 %v2540_v13  ;;  %v170_v45 = vld [vmem:[#allocation5 + $0x1a0] sm:$0xff]  ;;  %v88_v58 = vadd.f32 %v87_v50, %v86_v46  ;;  %v82_v59 = vadd.f32 %v81_v51, %v80_v47  ;;  %974 = vmatpush1.bf16.msra.mxu1 %v2542_v48  ;;  %v175_v26 = vld [vmem:[#allocation5 + $0x1c8] sm:$0xff] }
  0x59   :  { %934 = vmatprep.subr.bf16.mxu0 %v2549_v14  ;;  %v2573_v53 = vcombine.high %v166_v44, %v170_v45  ;;  %v174_v56 = vld [vmem:[#allocation5 + $0x1c0] sm:$0xff]  ;;  %v2572_v61 = vcombine.low %v166_v44, %v170_v45  ;;  %975 = vmatprep.subr.bf16.mxu1 %v2551_v52  ;;  %v167_v14 = vld [vmem:[#allocation5 + $0x188] sm:$0xff] }
  0x5a   :  { %v178_v57 = vld [vmem:[#allocation5 + $0x1e0] sm:$0xff]  ;;  %v91_v62 = vmul.f32 0.125, %v88_v58  ;;  %v90_v63 = vmul.f32 0.125, %v82_v59  ;;  %v2575_v24 = vcombine.high %v167_v14, %v171_v15  ;;  %v179_v27 = vld [vmem:[#allocation5 + $0x1e8] sm:$0xff]  ;;  %v2574_v33 = vcombine.low %v167_v14, %v171_v15 }
  0x5b   :  { %v2581_v1 = vcombine.high %v174_v56, %v178_v57  ;;  %v182_v4 = vld [vmem:[#allocation5 + $0x200] sm:$0xff]  ;;  %v2580_v8 = vcombine.low %v174_v56, %v178_v57  ;;  %v2583_v36 = vcombine.high %v175_v26, %v179_v27  ;;  %v183_v38 = vld [vmem:[#allocation5 + $0x208] sm:$0xff]  ;;  %v2582_v45 = vcombine.low %v175_v26, %v179_v27 }
  0x5c   :  { %935 = vmatpush1.bf16.msra.mxu0 %v2548_v18  ;;  %v186_v5 = vld [vmem:[#allocation5 + $0x220] sm:$0xff]  ;;  %v4082_v6 = vsub.f32 %v4073_v20, %v91_v62  ;;  %v4085_v7 = vsub.f32 %v4075_v21, %v90_v63  ;;  %976 = vmatpush1.bf16.msra.mxu1 %v2550_v60  ;;  %v2566_v21 = vcombine.low %v159_v2, %v163_v3  ;;  %v187_v39 = vld [vmem:[#allocation5 + $0x228] sm:$0xff] }
  0x5d   :  { %936 = vmatprep.subr.bf16.mxu0 %v2557_v28  ;;  %977 = vmatprep.subr.bf16.mxu1 %v2559_v0  ;;  %v2589_v13 = vcombine.high %v182_v4, %v186_v5  ;;  %v190_v16 = vld [vmem:[#allocation5 + $0x240] sm:$0xff]  ;;  %v2588_v20 = vcombine.low %v182_v4, %v186_v5  ;;  %v2591_v48 = vcombine.high %v183_v38, %v187_v39  ;;  %v191_v50 = vld [vmem:[#allocation5 + $0x248] sm:$0xff] }
  0x5e   :  { %v95_v10 = vmul.f32 %v4082_v6, %v4082_v6  ;;  %v94_v11 = vmul.f32 %v4085_v7, %v4085_v7  ;;  %v194_v17 = vld [vmem:[#allocation5 + $0x260] sm:$0xff]  ;;  %v195_v51 = vld [vmem:[#allocation5 + $0x268] sm:$0xff]  ;;  %v2590_v56 = vcombine.low %v183_v38, %v187_v39  ;;  %v132_v39 = vld [vmem:[#allocation5 + $0x70] sm:$0xff] }
  0x5f   :  { %v2597_v25 = vcombine.high %v190_v16, %v194_v17  ;;  %v198_v28 = vld [vmem:[#allocation5 + $0x280] sm:$0xff]  ;;  %v2596_v32 = vcombine.low %v190_v16, %v194_v17  ;;  %v2599_v60 = vcombine.high %v191_v50, %v195_v51  ;;  %v203_v63 = vld [vmem:[#allocation5 + $0x2a8] sm:$0xff]  ;;  %v2598_v2 = vcombine.low %v191_v50, %v195_v51  ;;  %v121_v51 = vld [vmem:[#allocation5 + $0x18] sm:$0xff] }
  0x60   :  { %937 = vmatpush1.bf16.msra.mxu0 %v2556_v37  ;;  %v102_v18 = vrot.slane %v95_v10, 4  ;;  %v96_v19 = vrot.slane %v94_v11, 4  ;;  %978 = vmatpush1.bf16.msra.mxu1 %v2558_v9  ;;  %v202_v29 = vld [vmem:[#allocation5 + $0x2a0] sm:$0xff]  ;;  %v207_v5 = vld [vmem:[#allocation5 + $0x2c8] sm:$0xff] }
  0x61   :  { %938 = vmatprep.subr.bf16.mxu0 %v2565_v41  ;;  %979 = vmatprep.subr.bf16.mxu1 %v2567_v12  ;;  %v2605_v37 = vcombine.high %v198_v28, %v202_v29  ;;  %v206_v40 = vld [vmem:[#allocation5 + $0x2c0] sm:$0xff]  ;;  %v2604_v44 = vcombine.low %v198_v28, %v202_v29  ;;  %v211_v9 = vld [vmem:[#allocation5 + $0x2e8] sm:$0xff]  ;;  %v120_v29 = vld [vmem:[#allocation5 + $0x10] sm:$0xff] }
  0x62   :  { %v103_v22 = vadd.f32 %v102_v18, %v95_v10  ;;  %v97_v23 = vadd.f32 %v96_v19, %v94_v11  ;;  %v210_v41 = vld [vmem:[#allocation5 + $0x2e0] sm:$0xff]  ;;  %v2615_v14 = vcombine.high %v207_v5, %v211_v9  ;;  %v215_v15 = vld [vmem:[#allocation5 + $0x308] sm:$0xff] }
  0x63   :  { %v214_v52 = vld [vmem:[#allocation5 + $0x300] sm:$0xff]  ;;  %v2612_v57 = vcombine.low %v206_v40, %v210_v41  ;;  %v219_v17 = vld [vmem:[#allocation5 + $0x328] sm:$0xff] }
  0x64   :  { %939 = vmatpush1.bf16.msra.mxu0 %v2564_v49  ;;  %v104_v30 = vrot.slane %v103_v22, 2  ;;  %v98_v31 = vrot.slane %v97_v23, 2  ;;  %980 = vmatpush1.bf16.msra.mxu1 %v2566_v21  ;;  %v2613_v49 = vcombine.high %v206_v40, %v210_v41  ;;  %v222_v0 = vld [vmem:[#allocation5 + $0x340] sm:$0xff]  ;;  %v227_v28 = vld [vmem:[#allocation5 + $0x368] sm:$0xff] }
  0x65   :  { %940 = vmatprep.subr.bf16.mxu0 %v2573_v53  ;;  %981 = vmatprep.subr.bf16.mxu1 %v2575_v24  ;;  %v218_v53 = vld [vmem:[#allocation5 + $0x320] sm:$0xff]  ;;  %v223_v24 = vld [vmem:[#allocation5 + $0x348] sm:$0xff] }
  0x66   :  { %v105_v34 = vadd.f32 %v104_v30, %v103_v22  ;;  %v99_v35 = vadd.f32 %v98_v31, %v97_v23  ;;  %v2621_v62 = vcombine.high %v214_v52, %v218_v53  ;;  %v2620_v3 = vcombine.low %v214_v52, %v218_v53  ;;  %v230_v10 = vld [vmem:[#allocation5 + $0x380] sm:$0xff]  ;;  %v124_v30 = vld [vmem:[#allocation5 + $0x30] sm:$0xff]  ;;  %v125_v53 = vld [vmem:[#allocation5 + $0x38] sm:$0xff] }
  0x67   :  { %v234_v11 = vld [vmem:[#allocation5 + $0x3a0] sm:$0xff]  ;;  %v2623_v23 = vcombine.high %v215_v15, %v219_v17  ;;  %v2529_v38 = vcombine.high %v120_v29, %v124_v30 }
  0x68   :  { %941 = vmatpush1.bf16.msra.mxu0 %v2572_v61  ;;  %v106_v42 = vrot.slane %v105_v34, 1  ;;  %v100_v43 = vrot.slane %v99_v35, 1  ;;  %982 = vmatpush1.bf16.msra.mxu1 %v2574_v33  ;;  %v199_v61 = vld [vmem:[#allocation5 + $0x288] sm:$0xff]  ;;  %v2637_v16 = vcombine.high %v230_v10, %v234_v11  ;;  %v238_v18 = vld [vmem:[#allocation5 + $0x3c0] sm:$0xff]  ;;  %v2636_v22 = vcombine.low %v230_v10, %v234_v11 }
  0x69   :  { %942 = vmatprep.subr.bf16.mxu0 %v2581_v1  ;;  %983 = vmatprep.subr.bf16.mxu1 %v2583_v36  ;;  %v226_v1 = vld [vmem:[#allocation5 + $0x360] sm:$0xff]  ;;  %v2607_v4 = vcombine.high %v199_v61, %v203_v63  ;;  %v2606_v12 = vcombine.low %v199_v61, %v203_v63  ;;  %v2622_v33 = vcombine.low %v215_v15, %v219_v17  ;;  %v231_v36 = vld [vmem:[#allocation5 + $0x388] sm:$0xff]  ;;  %v133_v61 = vld [vmem:[#allocation5 + $0x78] sm:$0xff] }
  0x6a   :  { %v107_v46 = vadd.f32 %v106_v42, %v105_v34  ;;  %v101_v47 = vadd.f32 %v100_v43, %v99_v35  ;;  %v242_v19 = vld [vmem:[#allocation5 + $0x3e0] sm:$0xff]  ;;  %v2631_v35 = vcombine.high %v223_v24, %v227_v28  ;;  %v239_v42 = vld [vmem:[#allocation5 + $0x3c8] sm:$0xff]  ;;  %v2528_v43 = vcombine.low %v120_v29, %v124_v30  ;;  %v156_v63 = vld [vmem:[#allocation5 + $0x130] sm:$0xff] }
  0x6b   :  { %v2645_v26 = vcombine.high %v238_v18, %v242_v19  ;;  %v2644_v34 = vcombine.low %v238_v18, %v242_v19  ;;  %v149_v15 = vld [vmem:[#allocation5 + $0xf8] sm:$0xff]  ;;  %v172_v17 = vld [vmem:[#allocation5 + $0x1b0] sm:$0xff] }
  0x6c   :  { %943 = vmatpush1.bf16.msra.mxu0 %v2580_v8  ;;  %v109_v54 = vmul.f32 0.125, %v107_v46  ;;  %v108_v55 = vmul.f32 0.125, %v101_v47  ;;  %984 = vmatpush1.bf16.msra.mxu1 %v2582_v45  ;;  %v2629_v8 = vcombine.high %v222_v0, %v226_v1  ;;  %v136_v46 = vld [vmem:[#allocation5 + $0x90] sm:$0xff]  ;;  %v153_v19 = vld [vmem:[#allocation5 + $0x118] sm:$0xff] }
  0x6d   :  { %944 = vmatprep.subr.bf16.mxu0 %v2589_v13  ;;  %985 = vmatprep.subr.bf16.mxu1 %v2591_v48  ;;  %v2628_v13 = vcombine.low %v222_v0, %v226_v1  ;;  %v140_v47 = vld [vmem:[#allocation5 + $0xb0] sm:$0xff]  ;;  %v2530_v0 = vcombine.low %v121_v51, %v125_v53 }
  0x6e   :  { %v111_v58 = vadd.f32 1e-05, %v109_v54  ;;  %v110_v59 = vadd.f32 1e-05, %v108_v55  ;;  %v2545_v52 = vcombine.high %v136_v46, %v140_v47  ;;  %v144_v54 = vld [vmem:[#allocation5 + $0xd0] sm:$0xff] }
  0x6f   :  { %v148_v55 = vld [vmem:[#allocation5 + $0xf0] sm:$0xff] }
  0x70   :  { %945 = vmatpush1.bf16.msra.mxu0 %v2588_v20  ;;  %3831 = vrsqrt.f32 %v111_v58  ;;  %986 = vmatpush1.bf16.msra.mxu1 %v2590_v56  ;;  %v2614_v20 = vcombine.low %v207_v5, %v211_v9  ;;  %v2531_v58 = vcombine.high %v121_v51, %v125_v53  ;;  %v2552_v1 = vcombine.low %v144_v54, %v148_v55  ;;  %v141_v5 = vld [vmem:[#allocation5 + $0xb8] sm:$0xff]  ;;  %v164_v9 = vld [vmem:[#allocation5 + $0x170] sm:$0xff] }
  0x71   :  { %946 = vmatprep.subr.bf16.mxu0 %v2597_v25  ;;  %3833 = vrsqrt.f32 %v110_v59  ;;  %987 = vmatprep.subr.bf16.mxu1 %v2599_v60  ;;  %v129_v59 = vld [vmem:[#allocation5 + $0x58] sm:$0xff]  ;;  %v2553_v60 = vcombine.high %v144_v54, %v148_v55  ;;  %v184_v30 = vld [vmem:[#allocation5 + $0x210] sm:$0xff] }
  0x72   :  { %v2538_v10 = vcombine.low %v129_v59, %v133_v61  ;;  %v189_v51 = vld [vmem:[#allocation5 + $0x238] sm:$0xff]  ;;  %v208_v53 = vld [vmem:[#allocation5 + $0x2d0] sm:$0xff] }
  0x73   :  { %v212_v54 = vld [vmem:[#allocation5 + $0x2f0] sm:$0xff] }
  0x74   :  { %947 = vmatpush1.bf16.msra.mxu0 %v2596_v32  ;;  %988 = vmatpush1.bf16.msra.mxu1 %v2598_v2  ;;  %v2539_v2 = vcombine.high %v129_v59, %v133_v61  ;;  %v197_v59 = vld [vmem:[#allocation5 + $0x278] sm:$0xff]  ;;  %v216_v61 = vld [vmem:[#allocation5 + $0x310] sm:$0xff] }
  0x75   :  { %948 = vmatprep.subr.bf16.mxu0 %v2605_v37  ;;  %989 = vmatprep.subr.bf16.mxu1 %v2607_v4  ;;  %v235_v37 = vld [vmem:[#allocation5 + $0x3a8] sm:$0xff] }
  0x76   :  { %v2639_v41 = vcombine.high %v231_v36, %v235_v37  ;;  %v2638_v48 = vcombine.low %v231_v36, %v235_v37  ;;  %v173_v36 = vld [vmem:[#allocation5 + $0x1b8] sm:$0xff] }
  0x78   :  { %949 = vmatpush1.bf16.msra.mxu0 %v2604_v44  ;;  %990 = vmatpush1.bf16.msra.mxu1 %v2606_v12  ;;  %v243_v44 = vld [vmem:[#allocation5 + $0x3e8] sm:$0xff] }
  0x79   :  { %950 = vmatprep.subr.bf16.mxu0 %v2613_v49  ;;  %991 = vmatprep.subr.bf16.mxu1 %v2615_v14  ;;  %v2647_v49 = vcombine.high %v239_v42, %v243_v44  ;;  %v2646_v56 = vcombine.low %v239_v42, %v243_v44  ;;  %v177_v42 = vld [vmem:[#allocation5 + $0x1d8] sm:$0xff] }
  0x7a   :  { %v3832_v21 = vpop.eup %3831 }
  0x7b   :  { %v3834_v25 = vpop.eup %3833  ;;  %v115_v27 = vmul.f32 %v3832_v21, %v4082_v6  ;;  %v128_v6 = vld [vmem:[#allocation5 + $0x50] sm:$0xff] }
  0x7c   :  { %951 = vmatpush1.bf16.msra.mxu0 %v2612_v57  ;;  %v114_v32 = vmul.f32 %v3834_v25, %v4085_v7  ;;  %992 = vmatpush1.bf16.msra.mxu1 %v2614_v20  ;;  %v2630_v7 = vcombine.low %v223_v24, %v227_v28  ;;  %v2537_v45 = vcombine.high %v128_v6, %v132_v39  ;;  %v176_v21 = vld [vmem:[#allocation5 + $0x1d0] sm:$0xff]  ;;  %v157_v24 = vld [vmem:[#allocation5 + $0x138] sm:$0xff] }
  0x7d   :  { %952 = vmatprep.subr.bf16.mxu0 %v2621_v62  ;;  %v4092_v31 = vpack.c.bf16 %v115_v27, %v115_v27  ;;  %993 = vmatprep.subr.bf16.mxu1 %v2623_v23  ;;  %v2536_v50 = vcombine.low %v128_v6, %v132_v39  ;;  %v2544_v57 = vcombine.low %v136_v46, %v140_v47  ;;  %v152_v62 = vld [vmem:[#allocation5 + $0x110] sm:$0xff]  ;;  %v161_v27 = vld [vmem:[#allocation5 + $0x158] sm:$0xff] }
  0x7e   :  { %v4097_v40 = vpack.c.bf16 %v114_v32, %v114_v32  ;;  %v2561_v4 = vcombine.high %v152_v62, %v156_v63  ;;  %v2560_v11 = vcombine.low %v152_v62, %v156_v63  ;;  %v165_v28 = vld [vmem:[#allocation5 + $0x178] sm:$0xff]  ;;  %v2563_v32 = vcombine.high %v153_v19, %v157_v24  ;;  %v196_v6 = vld [vmem:[#allocation5 + $0x270] sm:$0xff] }
  0x7f   :  { %960 = vmatprep.mubr.bf16.mxu0 %v4092_v31  ;;  %1001 = vmatprep.mubr.bf16.mxu1 %v4092_v31  ;;  %v2571_v39 = vcombine.high %v161_v27, %v165_v28  ;;  %v204_v46 = vld [vmem:[#allocation5 + $0x2b0] sm:$0xff] }
  0x80   :  { %953 = vmatpush1.bf16.msra.mxu0 %v2620_v3  ;;  %994 = vmatpush1.bf16.msra.mxu1 %v2622_v33  ;;  %v137_v3 = vld [vmem:[#allocation5 + $0x98] sm:$0xff]  ;;  %v220_v62 = vld [vmem:[#allocation5 + $0x330] sm:$0xff] }
  0x81   :  { %954 = vmatprep.subr.bf16.mxu0 %v2629_v8  ;;  %995 = vmatprep.subr.bf16.mxu1 %v2631_v35  ;;  %v160_v8 = vld [vmem:[#allocation5 + $0x150] sm:$0xff]  ;;  %v2547_v12 = vcombine.high %v137_v3, %v141_v5  ;;  %v2546_v18 = vcombine.low %v137_v3, %v141_v5  ;;  %v169_v35 = vld [vmem:[#allocation5 + $0x198] sm:$0xff] }
  0x82   :  { %v2569_v14 = vcombine.high %v160_v8, %v164_v9  ;;  %v2568_v20 = vcombine.low %v160_v8, %v164_v9  ;;  %v2579_v47 = vcombine.high %v169_v35, %v173_v36  ;;  %v205_v3 = vld [vmem:[#allocation5 + $0x2b8] sm:$0xff]  ;;  %v224_v5 = vld [vmem:[#allocation5 + $0x350] sm:$0xff] }
  0x83   :  { %v228_v8 = vld [vmem:[#allocation5 + $0x370] sm:$0xff] }
  0x84   :  { %955 = vmatpush1.bf16.msra.mxu0 %v2628_v13  ;;  %996 = vmatpush1.bf16.msra.mxu1 %v2630_v7  ;;  %v145_v13 = vld [vmem:[#allocation5 + $0xd8] sm:$0xff] }
  0x85   :  { %956 = vmatprep.subr.bf16.mxu0 %v2637_v16  ;;  %997 = vmatprep.subr.bf16.mxu1 %v2639_v41  ;;  %v168_v16 = vld [vmem:[#allocation5 + $0x190] sm:$0xff]  ;;  %v2555_v23 = vcombine.high %v145_v13, %v149_v15  ;;  %v2570_v41 = vcombine.low %v161_v27, %v165_v28  ;;  %v225_v28 = vld [vmem:[#allocation5 + $0x358] sm:$0xff] }
  0x86   :  { %v2577_v25 = vcombine.high %v168_v16, %v172_v17  ;;  %v2576_v29 = vcombine.low %v168_v16, %v172_v17  ;;  %v236_v16 = vld [vmem:[#allocation5 + $0x3b0] sm:$0xff] }
  0x88   :  { %957 = vmatpush1.bf16.msra.mxu0 %v2636_v22  ;;  %998 = vmatpush1.bf16.msra.mxu1 %v2638_v48  ;;  %v180_v22 = vld [vmem:[#allocation5 + $0x1f0] sm:$0xff] }
  0x89   :  { %958 = vmatprep.subr.bf16.mxu0 %v2645_v26  ;;  %999 = vmatprep.subr.bf16.mxu1 %v2647_v49  ;;  %v2554_v26 = vcombine.low %v145_v13, %v149_v15  ;;  %v2585_v33 = vcombine.high %v176_v21, %v180_v22  ;;  %v2584_v37 = vcombine.low %v176_v21, %v180_v22  ;;  %v213_v13 = vld [vmem:[#allocation5 + $0x2f8] sm:$0xff]  ;;  %v232_v15 = vld [vmem:[#allocation5 + $0x390] sm:$0xff] }
  0x8a   :  { %v2578_v49 = vcombine.low %v169_v35, %v173_v36  ;;  %v221_v21 = vld [vmem:[#allocation5 + $0x338] sm:$0xff]  ;;  %v2632_v22 = vcombine.low %v224_v5, %v228_v8 }
  0x8b   :  { %v237_v35 = vld [vmem:[#allocation5 + $0x3b8] sm:$0xff] }
  0x8c   :  { %959 = vmatpush1.bf16.msra.mxu0 %v2644_v34  ;;  %1000 = vmatpush1.bf16.msra.mxu1 %v2646_v56  ;;  %v2562_v34 = vcombine.low %v153_v19, %v157_v24  ;;  %v244_v24 = vld [vmem:[#allocation5 + $0x3f0] sm:$0xff]  ;;  %v3447_v36 = vld [vmem:[#allocation8 + $0x4] ss:$16 sps:$4 sm:$0xff]  }
  0x8d   :  { %1010 = vmatprep.subr.bf16.mxu0 %v2529_v38  ;;  %1051 = vmatprep.subr.bf16.mxu1 %v2531_v58  ;;  %v192_v38 = vld [vmem:[#allocation5 + $0x250] sm:$0xff]  ;;  %v193_v58 = vld [vmem:[#allocation5 + $0x258] sm:$0xff] }
  0x8e   :  { %v2601_v48 = vcombine.high %v192_v38, %v196_v6  ;;  %v2603_v9 = vcombine.high %v193_v58, %v197_v59 }
  0x8f   :  { %961 = vmatmul.mubr.bf16.vlgmr.msra.gmra.mrb[0].mxu0 %v4097_v40  ;;  %1002 = vmatmul.mubr.bf16.vlgmr.msra.gmra.mrb[0].mxu1 %v4097_v40 }
  0x90   :  { %1011 = vmatpush1.bf16.msra.mxu0 %v2528_v43  ;;  %1042 = vmatprep.mubr.bf16.mxu0 %v4092_v31  ;;  %v181_v43 = vld [vmem:[#allocation5 + $0x1f8] sm:$0xff] }
  0x91   :  { %1012 = vmatprep.subr.bf16.mxu0 %v2537_v45  ;;  %1052 = vmatpush1.bf16.msra.mxu1 %v2530_v0  ;;  %v200_v45 = vld [vmem:[#allocation5 + $0x290] sm:$0xff]  ;;  %v2587_v55 = vcombine.high %v177_v42, %v181_v43  ;;  %v2617_v0 = vcombine.high %v208_v53, %v212_v54 }
  0x92   :  { %1083 = vmatprep.mubr.bf16.mxu1 %v4092_v31  ;;  %1053 = vmatprep.subr.bf16.mxu1 %v2539_v2  ;;  %v188_v31 = vld [vmem:[#allocation5 + $0x230] sm:$0xff]  ;;  %v2609_v56 = vcombine.high %v200_v45, %v204_v46  ;;  %v201_v2 = vld [vmem:[#allocation5 + $0x298] sm:$0xff] }
  0x93   :  { %v2593_v7 = vcombine.high %v184_v30, %v188_v31  ;;  %v2592_v44 = vcombine.low %v184_v30, %v188_v31  ;;  %v2611_v17 = vcombine.high %v201_v2, %v205_v3  ;;  %v2610_v19 = vcombine.low %v201_v2, %v205_v3  ;;  %v3489_v2 = vld [vmem:[#allocation8 + $0xe4] ss:$16 sps:$4 sm:$0xff]   ;;  %v3476_v3 = vld [vmem:[#allocation8 + $0x88] ss:$16 sps:$4 sm:$0xff]  }
  0x94   :  { %1013 = vmatpush1.bf16.msra.mxu0 %v2536_v50  ;;  %v185_v50 = vld [vmem:[#allocation5 + $0x218] sm:$0xff]  ;;  %v2640_v30 = vcombine.low %v232_v15, %v236_v16 }
  0x95   :  { %1014 = vmatprep.subr.bf16.mxu0 %v2545_v52  ;;  %1054 = vmatpush1.bf16.msra.mxu1 %v2538_v10  ;;  %v2600_v52 = vcombine.low %v192_v38, %v196_v6  ;;  %v2595_v63 = vcombine.high %v185_v50, %v189_v51  ;;  %v2625_v10 = vcombine.high %v216_v61, %v220_v62  ;;  %v3449_v6 = vld [vmem:[#allocation8] ss:$16 sps:$4 sm:$0xff]  }
  0x96   :  { %1055 = vmatprep.subr.bf16.mxu1 %v2547_v12  ;;  %v209_v12 = vld [vmem:[#allocation5 + $0x2d8] sm:$0xff] }
  0x97   :  { %v2618_v27 = vcombine.low %v209_v12, %v213_v13 }
  0x98   :  { %1015 = vmatpush1.bf16.msra.mxu0 %v2544_v57  ;;  %v2586_v57 = vcombine.low %v177_v42, %v181_v43  ;;  %v3453_v42 = vld [vmem:[#allocation8 + $0x24] ss:$16 sps:$4 sm:$0xff]  }
  0x99   :  { %1016 = vmatprep.subr.bf16.mxu0 %v2553_v60  ;;  %1056 = vmatpush1.bf16.msra.mxu1 %v2546_v18  ;;  %v2608_v60 = vcombine.low %v200_v45, %v204_v46  ;;  %v2633_v18 = vcombine.high %v224_v5, %v228_v8  ;;  %v3459_v46 = vld [vmem:[#allocation8 + $0x44] ss:$16 sps:$4 sm:$0xff]   ;;  %v3491_v5 = vld [vmem:[#allocation8 + $0xe0] ss:$16 sps:$4 sm:$0xff]  }
  0x9a   :  { %1057 = vmatprep.subr.bf16.mxu1 %v2555_v23  ;;  %v240_v23 = vld [vmem:[#allocation5 + $0x3d0] sm:$0xff]  ;;  %v3495_v8 = vld [vmem:[#allocation8 + $0x104] ss:$16 sps:$4 sm:$0xff]  }
  0x9c   :  { %1017 = vmatpush1.bf16.msra.mxu0 %v2552_v1  ;;  %v2594_v1 = vcombine.low %v185_v50, %v189_v51  ;;  %v3465_v51 = vld [vmem:[#allocation8 + $0x64] ss:$16 sps:$4 sm:$0xff]  }
  0x9d   :  { %1018 = vmatprep.subr.bf16.mxu0 %v2561_v4  ;;  %1058 = vmatpush1.bf16.msra.mxu1 %v2554_v26  ;;  %v2616_v4 = vcombine.low %v208_v53, %v212_v54  ;;  %v2641_v26 = vcombine.high %v232_v15, %v236_v16  ;;  %v3456_v53 = vld [vmem:[#allocation8 + $0x2c] ss:$16 sps:$4 sm:$0xff]   ;;  %v3467_v54 = vld [vmem:[#allocation8 + $0x60] ss:$16 sps:$4 sm:$0xff]   ;;  %v3507_v16 = vld [vmem:[#allocation8 + $0x144] ss:$16 sps:$4 sm:$0xff]  }
  0x9e   :  { %1059 = vmatprep.subr.bf16.mxu1 %v2563_v32  ;;  %v2649_v32 = vcombine.high %v240_v23, %v244_v24  ;;  %v3503_v15 = vld [vmem:[#allocation8 + $0x120] ss:$16 sps:$4 sm:$0xff]  }
  0xa0   :  { %1019 = vmatpush1.bf16.msra.mxu0 %v2560_v11  ;;  %v2602_v11 = vcombine.low %v193_v58, %v197_v59  ;;  %v3473_v58 = vld [vmem:[#allocation8 + $0x80] ss:$16 sps:$4 sm:$0xff]   ;;  %v3477_v59 = vld [vmem:[#allocation8 + $0xa4] ss:$16 sps:$4 sm:$0xff]  }
  0xa1   :  { %1020 = vmatprep.subr.bf16.mxu0 %v2569_v14  ;;  %1060 = vmatpush1.bf16.msra.mxu1 %v2562_v34  ;;  %v2624_v14 = vcombine.low %v216_v61, %v220_v62  ;;  %v233_v34 = vld [vmem:[#allocation5 + $0x398] sm:$0xff]  ;;  %v3468_v61 = vld [vmem:[#allocation8 + $0x6c] ss:$16 sps:$4 sm:$0xff]  }
  0xa2   :  { %1061 = vmatprep.subr.bf16.mxu1 %v2571_v39  ;;  %v2643_v43 = vcombine.high %v233_v34, %v237_v35  ;;  %v2642_v45 = vcombine.low %v233_v34, %v237_v35  ;;  %v3479_v62 = vld [vmem:[#allocation8 + $0xa0] ss:$16 sps:$4 sm:$0xff]   ;;  %v3522_v34 = vld [vmem:[#allocation8 + $0x18c] ss:$16 sps:$4 sm:$0xff]  }
  0xa3   :  { %v3533_v35 = vld [vmem:[#allocation8 + $0x1c0] ss:$16 sps:$4 sm:$0xff]  }
  0xa4   :  { %1021 = vmatpush1.bf16.msra.mxu0 %v2568_v20  ;;  %v217_v20 = vld [vmem:[#allocation5 + $0x318] sm:$0xff] }
  0xa5   :  { %1022 = vmatprep.subr.bf16.mxu0 %v2577_v25  ;;  %1062 = vmatpush1.bf16.msra.mxu1 %v2570_v41  ;;  %v2619_v25 = vcombine.high %v209_v12, %v213_v13  ;;  %v2627_v31 = vcombine.high %v217_v20, %v221_v21  ;;  %v245_v41 = vld [vmem:[#allocation5 + $0x3f8] sm:$0xff]  ;;  %v3488_v13 = vld [vmem:[#allocation8 + $0xc8] ss:$16 sps:$4 sm:$0xff]  }
  0xa6   :  { %1063 = vmatprep.subr.bf16.mxu1 %v2579_v47  ;;  %v3501_v12 = vld [vmem:[#allocation8 + $0x124] ss:$16 sps:$4 sm:$0xff]  }
  0xa8   :  { %1023 = vmatpush1.bf16.msra.mxu0 %v2576_v29  ;;  %v229_v29 = vld [vmem:[#allocation5 + $0x378] sm:$0xff] }
  0xa9   :  { %1024 = vmatprep.subr.bf16.mxu0 %v2585_v33  ;;  %1064 = vmatpush1.bf16.msra.mxu1 %v2578_v49  ;;  %v2626_v33 = vcombine.low %v217_v20, %v221_v21  ;;  %v2635_v38 = vcombine.high %v225_v28, %v229_v29  ;;  %v2634_v39 = vcombine.low %v225_v28, %v229_v29  ;;  %v3461_v49 = vld [vmem:[#allocation8 + $0x40] ss:$16 sps:$4 sm:$0xff]   ;;  %v3513_v20 = vld [vmem:[#allocation8 + $0x164] ss:$16 sps:$4 sm:$0xff]   ;;  %v3500_v21 = vld [vmem:[#allocation8 + $0x108] ss:$16 sps:$4 sm:$0xff]  }
  0xaa   :  { %1065 = vmatprep.subr.bf16.mxu1 %v2587_v55  ;;  %v3471_v55 = vld [vmem:[#allocation8 + $0x84] ss:$16 sps:$4 sm:$0xff]   ;;  %v3512_v29 = vld [vmem:[#allocation8 + $0x148] ss:$16 sps:$4 sm:$0xff]  }
  0xab   :  { %v3525_v28 = vld [vmem:[#allocation8 + $0x1a4] ss:$16 sps:$4 sm:$0xff]  }
  0xac   :  { %1025 = vmatpush1.bf16.msra.mxu0 %v2584_v37  ;;  %v2648_v37 = vcombine.low %v240_v23, %v244_v24  ;;  %v3515_v23 = vld [vmem:[#allocation8 + $0x160] ss:$16 sps:$4 sm:$0xff]   ;;  %v3519_v24 = vld [vmem:[#allocation8 + $0x184] ss:$16 sps:$4 sm:$0xff]  }
  0xad   :  { %1026 = vmatprep.subr.bf16.mxu0 %v2593_v7  ;;  %1066 = vmatpush1.bf16.msra.mxu1 %v2586_v57  ;;  %v241_v7 = vld [vmem:[#allocation5 + $0x3d8] sm:$0xff]  ;;  %v3462_v57 = vld [vmem:[#allocation8 + $0x4c] ss:$16 sps:$4 sm:$0xff]  }
  0xae   :  { %1067 = vmatprep.subr.bf16.mxu1 %v2595_v63  ;;  %v2651_v47 = vcombine.high %v241_v7, %v245_v41  ;;  %v2650_v50 = vcombine.low %v241_v7, %v245_v41  ;;  %v3483_v63 = vld [vmem:[#allocation8 + $0xc4] ss:$16 sps:$4 sm:$0xff]   ;;  %v3530_v7 = vld [vmem:[#allocation8 + $0x1a8] ss:$16 sps:$4 sm:$0xff]   ;;  %v3534_v41 = vld [vmem:[#allocation8 + $0x1cc] ss:$16 sps:$4 sm:$0xff]  }
  0xb0   :  { %1027 = vmatpush1.bf16.msra.mxu0 %v2592_v44  ;;  %v3455_v44 = vld [vmem:[#allocation8 + $0x20] ss:$16 sps:$4 sm:$0xff]  }
  0xb1   :  { %1028 = vmatprep.subr.bf16.mxu0 %v2601_v48  ;;  %1068 = vmatpush1.bf16.msra.mxu1 %v2594_v1  ;;  %v3450_v48 = vld [vmem:[#allocation8 + $0xc] ss:$16 sps:$4 sm:$0xff]  }
  0xb2   :  { %1069 = vmatprep.subr.bf16.mxu1 %v2603_v9  ;;  %v3474_v1 = vld [vmem:[#allocation8 + $0x8c] ss:$16 sps:$4 sm:$0xff]   ;;  %v3482_v9 = vld [vmem:[#allocation8 + $0xa8] ss:$16 sps:$4 sm:$0xff]  }
  0xb4   :  { %1029 = vmatpush1.bf16.msra.mxu0 %v2600_v52  ;;  %v3452_v52 = vld [vmem:[#allocation8 + $0x8] ss:$16 sps:$4 sm:$0xff]  }
  0xb5   :  { %1030 = vmatprep.subr.bf16.mxu0 %v2609_v56  ;;  %1070 = vmatpush1.bf16.msra.mxu1 %v2602_v11  ;;  %v3458_v56 = vld [vmem:[#allocation8 + $0x28] ss:$16 sps:$4 sm:$0xff]   ;;  %v3497_v11 = vld [vmem:[#allocation8 + $0x100] ss:$16 sps:$4 sm:$0xff]  }
  0xb6   :  { %1071 = vmatprep.subr.bf16.mxu1 %v2611_v17  ;;  %v3494_v17 = vld [vmem:[#allocation8 + $0xe8] ss:$16 sps:$4 sm:$0xff]  }
  0xb8   :  { %1031 = vmatpush1.bf16.msra.mxu0 %v2608_v60  ;;  %v3464_v60 = vld [vmem:[#allocation8 + $0x48] ss:$16 sps:$4 sm:$0xff]  }
  0xb9   :  { %1032 = vmatprep.subr.bf16.mxu0 %v2617_v0  ;;  %1072 = vmatpush1.bf16.msra.mxu1 %v2610_v19  ;;  %v3470_v0 = vld [vmem:[#allocation8 + $0x68] ss:$16 sps:$4 sm:$0xff]   ;;  %v3509_v19 = vld [vmem:[#allocation8 + $0x140] ss:$16 sps:$4 sm:$0xff]  }
  0xba   :  { %1073 = vmatprep.subr.bf16.mxu1 %v2619_v25  ;;  %v3506_v25 = vld [vmem:[#allocation8 + $0x128] ss:$16 sps:$4 sm:$0xff]  }
  0xbc   :  { %1033 = vmatpush1.bf16.msra.mxu0 %v2616_v4  ;;  %v3480_v4 = vld [vmem:[#allocation8 + $0xac] ss:$16 sps:$4 sm:$0xff]  }
  0xbd   :  { %1034 = vmatprep.subr.bf16.mxu0 %v2625_v10  ;;  %1074 = vmatpush1.bf16.msra.mxu1 %v2618_v27  ;;  %v3486_v10 = vld [vmem:[#allocation8 + $0xcc] ss:$16 sps:$4 sm:$0xff]   ;;  %v3521_v27 = vld [vmem:[#allocation8 + $0x180] ss:$16 sps:$4 sm:$0xff]  }
  0xbe   :  { %1075 = vmatprep.subr.bf16.mxu1 %v2627_v31  ;;  %v3527_v31 = vld [vmem:[#allocation8 + $0x1a0] ss:$16 sps:$4 sm:$0xff]  }
  0xc0   :  { %1035 = vmatpush1.bf16.msra.mxu0 %v2624_v14  ;;  %v3492_v14 = vld [vmem:[#allocation8 + $0xec] ss:$16 sps:$4 sm:$0xff]  }
  0xc1   :  { %1036 = vmatprep.subr.bf16.mxu0 %v2633_v18  ;;  %1076 = vmatpush1.bf16.msra.mxu1 %v2626_v33  ;;  %v3498_v18 = vld [vmem:[#allocation8 + $0x10c] ss:$16 sps:$4 sm:$0xff]   ;;  %v3518_v33 = vld [vmem:[#allocation8 + $0x168] ss:$16 sps:$4 sm:$0xff]  }
  0xc2   :  { %1077 = vmatprep.subr.bf16.mxu1 %v2635_v38  ;;  %v3528_v38 = vld [vmem:[#allocation8 + $0x1ac] ss:$16 sps:$4 sm:$0xff]  }
  0xc4   :  { %1037 = vmatpush1.bf16.msra.mxu0 %v2632_v22  ;;  %v3504_v22 = vld [vmem:[#allocation8 + $0x12c] ss:$16 sps:$4 sm:$0xff]  }
  0xc5   :  { %1038 = vmatprep.subr.bf16.mxu0 %v2641_v26  ;;  %1078 = vmatpush1.bf16.msra.mxu1 %v2634_v39  ;;  %v3510_v26 = vld [vmem:[#allocation8 + $0x14c] ss:$16 sps:$4 sm:$0xff]   ;;  %v3543_v39 = vld [vmem:[#allocation8 + $0x204] ss:$16 sps:$4 sm:$0xff]  }
  0xc6   :  { %1079 = vmatprep.subr.bf16.mxu1 %v2643_v43  ;;  %v3540_v43 = vld [vmem:[#allocation8 + $0x1ec] ss:$16 sps:$4 sm:$0xff]  }
  0xc8   :  { %1039 = vmatpush1.bf16.msra.mxu0 %v2640_v30  ;;  %v3516_v30 = vld [vmem:[#allocation8 + $0x16c] ss:$16 sps:$4 sm:$0xff]  }
  0xc9   :  { %1040 = vmatprep.subr.bf16.mxu0 %v2649_v32  ;;  %1080 = vmatpush1.bf16.msra.mxu1 %v2642_v45  ;;  %v3531_v32 = vld [vmem:[#allocation8 + $0x1c4] ss:$16 sps:$4 sm:$0xff]   ;;  %v3546_v45 = vld [vmem:[#allocation8 + $0x20c] ss:$16 sps:$4 sm:$0xff]  }
  0xca   :  { %1081 = vmatprep.subr.bf16.mxu1 %v2651_v47 }
  0xcc   :  { %1041 = vmatpush1.bf16.msra.mxu0 %v2648_v37  ;;  %v3524_v37 = vld [vmem:[#allocation8 + $0x188] ss:$16 sps:$4 sm:$0xff]  }
  0xcd   :  { %2654 = vmatprep.subr.bf16.mxu0 %v3447_v36  ;;  %1082 = vmatpush1.bf16.msra.mxu1 %v2650_v50  ;;  %v3537_v36 = vld [vmem:[#allocation8 + $0x1e4] ss:$16 sps:$4 sm:$0xff]  }
  0xce   :  { %2782 = vmatprep.subr.bf16.mxu1 %v3450_v48 }
  0xcf   :  { %1043 = vmatmul.mubr.bf16.vlgmr.msra.gmra.mrb[4].mxu0 %v4097_v40 }
  0xd0   :  { %2656 = vmatpush1.bf16.msra.mxu0 %v3449_v6  ;;  %1084 = vmatmul.mubr.bf16.vlgmr.msra.gmra.mrb[4].mxu1 %v4097_v40  ;;  %v3485_v40 = vld [vmem:[#allocation8 + $0xc0] ss:$16 sps:$4 sm:$0xff]  }
  0xd1   :  { %2658 = vmatprep.subr.bf16.mxu0 %v3453_v42  ;;  %2784 = vmatpush1.bf16.msra.mxu1 %v3452_v52  ;;  %v3539_v6 = vld [vmem:[#allocation8 + $0x1e0] ss:$16 sps:$4 sm:$0xff]   ;;  %v3536_v42 = vld [vmem:[#allocation8 + $0x1c8] ss:$16 sps:$4 sm:$0xff]  }
  0xd2   :  { %2786 = vmatprep.subr.bf16.mxu1 %v3456_v53 }
  0xd4   :  { %2660 = vmatpush1.bf16.msra.mxu0 %v3455_v44  ;;  %v3542_v44 = vld [vmem:[#allocation8 + $0x1e8] ss:$16 sps:$4 sm:$0xff]  }
  0xd5   :  { %2662 = vmatprep.subr.bf16.mxu0 %v3459_v46  ;;  %2788 = vmatpush1.bf16.msra.mxu1 %v3458_v56  ;;  %v248_v46 = vlaneseq }
  0xd6   :  { %2790 = vmatprep.subr.bf16.mxu1 %v3462_v57 }
  0xd7   :  { %v4105_v47 = vshrl.u32 %v248_v46, 7  ;;  %v3608_v46 = vld [vmem:[#allocation8 + $0x348] ss:$16 sps:$4 sm:$0xff]  }
  0xd8   :  { %2664 = vmatpush1.bf16.msra.mxu0 %v3461_v49  ;;  %v4110_v49 = vld [vmem:[#allocation7] sm:$0xff] }
  0xd9   :  { %2666 = vmatprep.subr.bf16.mxu0 %v3465_v51  ;;  %2792 = vmatpush1.bf16.msra.mxu1 %v3464_v60  ;;  %v4108_v48 = vsub.s32 0, %v4105_v47  ;;  %v4113_v50 = vsub.s32 1, %v4105_v47 }
  0xda   :  { %2794 = vmatprep.subr.bf16.mxu1 %v3468_v61  ;;  %v3549_v61 = vld [vmem:[#allocation8 + $0x224] ss:$16 sps:$4 sm:$0xff]  }
  0xdb   :  { %v251_v51 = vrot.slane %v4110_v49, %v4108_v48  ;;  %v255_v52 = vrot.slane %v4110_v49, %v4113_v50 }
  0xdc   :  { %2668 = vmatpush1.bf16.msra.mxu0 %v3467_v54 }
  0xdd   :  { %2670 = vmatprep.subr.bf16.mxu0 %v3471_v55  ;;  %2796 = vmatpush1.bf16.msra.mxu1 %v3470_v0  ;;  %v4123_v0 = vsub.s32 3, %v4105_v47 }
  0xde   :  { %2798 = vmatprep.subr.bf16.mxu1 %v3474_v1  ;;  %v3551_v1 = vld [vmem:[#allocation8 + $0x220] ss:$16 sps:$4 sm:$0xff]  }
  0xe0   :  { %2672 = vmatpush1.bf16.msra.mxu0 %v3473_v58  ;;  %v3545_v58 = vld [vmem:[#allocation8 + $0x200] ss:$16 sps:$4 sm:$0xff]  }
  0xe1   :  { %2674 = vmatprep.subr.bf16.mxu0 %v3477_v59  ;;  %2800 = vmatpush1.bf16.msra.mxu1 %v3476_v3  ;;  %v3548_v59 = vld [vmem:[#allocation8 + $0x208] ss:$16 sps:$4 sm:$0xff]   ;;  %v3558_v3 = vld [vmem:[#allocation8 + $0x24c] ss:$16 sps:$4 sm:$0xff]  }
  0xe2   :  { %2802 = vmatprep.subr.bf16.mxu1 %v3480_v4 }
  0xe4   :  { %2676 = vmatpush1.bf16.msra.mxu0 %v3479_v62  ;;  %v3552_v62 = vld [vmem:[#allocation8 + $0x22c] ss:$16 sps:$4 sm:$0xff]  }
  0xe5   :  { %2678 = vmatprep.subr.bf16.mxu0 %v3483_v63  ;;  %2804 = vmatpush1.bf16.msra.mxu1 %v3482_v9  ;;  %v4120_v63 = vsub.s32 2, %v4105_v47  ;;  %v3560_v9 = vld [vmem:[#allocation8 + $0x248] ss:$16 sps:$4 sm:$0xff]  }
  0xe6   :  { %2806 = vmatprep.subr.bf16.mxu1 %v3486_v10  ;;  %v3561_v10 = vld [vmem:[#allocation8 + $0x264] ss:$16 sps:$4 sm:$0xff]  }
  0xe7   :  { %v259_v4 = vrot.slane %v4110_v49, %v4120_v63 }
  0xe8   :  { %2680 = vmatpush1.bf16.msra.mxu0 %v3485_v40  ;;  %v3554_v40 = vld [vmem:[#allocation8 + $0x228] ss:$16 sps:$4 sm:$0xff]  }
  0xe9   :  { %2682 = vmatprep.subr.bf16.mxu0 %v3489_v2  ;;  %2808 = vmatpush1.bf16.msra.mxu1 %v3488_v13  ;;  %v3555_v2 = vld [vmem:[#allocation8 + $0x244] ss:$16 sps:$4 sm:$0xff]  }
  0xea   :  { %2810 = vmatprep.subr.bf16.mxu1 %v3492_v14 }
  0xec   :  { %2684 = vmatpush1.bf16.msra.mxu0 %v3491_v5  ;;  %v263_v5 = vrot.slane %v4110_v49, %v4123_v0 }
  0xed   :  { %2686 = vmatprep.subr.bf16.mxu0 %v3495_v8  ;;  %2812 = vmatpush1.bf16.msra.mxu1 %v3494_v17  ;;  %v3557_v8 = vld [vmem:[#allocation8 + $0x240] ss:$16 sps:$4 sm:$0xff]  }
  0xee   :  { %2814 = vmatprep.subr.bf16.mxu1 %v3498_v18  ;;  %v3563_v17 = vld [vmem:[#allocation8 + $0x260] ss:$16 sps:$4 sm:$0xff]   ;;  %v3566_v18 = vld [vmem:[#allocation8 + $0x268] ss:$16 sps:$4 sm:$0xff]  }
  0xf0   :  { %2688 = vmatpush1.bf16.msra.mxu0 %v3497_v11  ;;  %v3564_v11 = vld [vmem:[#allocation8 + $0x26c] ss:$16 sps:$4 sm:$0xff]  }
  0xf1   :  { %2690 = vmatprep.subr.bf16.mxu0 %v3501_v12  ;;  %2816 = vmatpush1.bf16.msra.mxu1 %v3500_v21  ;;  %v3570_v21 = vld [vmem:[#allocation8 + $0x28c] ss:$16 sps:$4 sm:$0xff]  }
  0xf2   :  { %2818 = vmatprep.subr.bf16.mxu1 %v3504_v22  ;;  %v3569_v22 = vld [vmem:[#allocation8 + $0x280] ss:$16 sps:$4 sm:$0xff]  }
  0xf4   :  { %2692 = vmatpush1.bf16.msra.mxu0 %v3503_v15 }
  0xf5   :  { %2694 = vmatprep.subr.bf16.mxu0 %v3507_v16  ;;  %2820 = vmatpush1.bf16.msra.mxu1 %v3506_v25  ;;  %v3576_v25 = vld [vmem:[#allocation8 + $0x2ac] ss:$16 sps:$4 sm:$0xff]  }
  0xf6   :  { %2822 = vmatprep.subr.bf16.mxu1 %v3510_v26  ;;  %v3575_v26 = vld [vmem:[#allocation8 + $0x2a0] ss:$16 sps:$4 sm:$0xff]  }
  0xf8   :  { %2696 = vmatpush1.bf16.msra.mxu0 %v3509_v19 }
  0xf9   :  { %2698 = vmatprep.subr.bf16.mxu0 %v3513_v20  ;;  %2824 = vmatpush1.bf16.msra.mxu1 %v3512_v29  ;;  %v3567_v20 = vld [vmem:[#allocation8 + $0x284] ss:$16 sps:$4 sm:$0xff]   ;;  %v3582_v29 = vld [vmem:[#allocation8 + $0x2cc] ss:$16 sps:$4 sm:$0xff]  }
  0xfa   :  { %2826 = vmatprep.subr.bf16.mxu1 %v3516_v30  ;;  %v3581_v30 = vld [vmem:[#allocation8 + $0x2c0] ss:$16 sps:$4 sm:$0xff]  }
  0xfc   :  { %2700 = vmatpush1.bf16.msra.mxu0 %v3515_v23  ;;  %v3572_v23 = vld [vmem:[#allocation8 + $0x288] ss:$16 sps:$4 sm:$0xff]  }
  0xfd   :  { %2702 = vmatprep.subr.bf16.mxu0 %v3519_v24  ;;  %2828 = vmatpush1.bf16.msra.mxu1 %v3518_v33  ;;  %v3573_v24 = vld [vmem:[#allocation8 + $0x2a4] ss:$16 sps:$4 sm:$0xff]   ;;  %v3588_v33 = vld [vmem:[#allocation8 + $0x2ec] ss:$16 sps:$4 sm:$0xff]  }
  0xfe   :  { %2830 = vmatprep.subr.bf16.mxu1 %v3522_v34  ;;  %v3587_v34 = vld [vmem:[#allocation8 + $0x2e0] ss:$16 sps:$4 sm:$0xff]  }
 0x100   :  { %2704 = vmatpush1.bf16.msra.mxu0 %v3521_v27  ;;  %v3578_v27 = vld [vmem:[#allocation8 + $0x2a8] ss:$16 sps:$4 sm:$0xff]  }
 0x101   :  { %2706 = vmatprep.subr.bf16.mxu0 %v3525_v28  ;;  %2832 = vmatpush1.bf16.msra.mxu1 %v3524_v37  ;;  %v3579_v28 = vld [vmem:[#allocation8 + $0x2c4] ss:$16 sps:$4 sm:$0xff]   ;;  %v3594_v37 = vld [vmem:[#allocation8 + $0x30c] ss:$16 sps:$4 sm:$0xff]  }
 0x102   :  { %2834 = vmatprep.subr.bf16.mxu1 %v3528_v38  ;;  %v3593_v38 = vld [vmem:[#allocation8 + $0x300] ss:$16 sps:$4 sm:$0xff]  }
 0x104   :  { %2708 = vmatpush1.bf16.msra.mxu0 %v3527_v31  ;;  %v3584_v31 = vld [vmem:[#allocation8 + $0x2c8] ss:$16 sps:$4 sm:$0xff]  }
 0x105   :  { %2710 = vmatprep.subr.bf16.mxu0 %v3531_v32  ;;  %2836 = vmatpush1.bf16.msra.mxu1 %v3530_v7  ;;  %v3585_v32 = vld [vmem:[#allocation8 + $0x2e4] ss:$16 sps:$4 sm:$0xff]   ;;  %v3600_v7 = vld [vmem:[#allocation8 + $0x32c] ss:$16 sps:$4 sm:$0xff]  }
 0x106   :  { %2838 = vmatprep.subr.bf16.mxu1 %v3534_v41  ;;  %v3599_v41 = vld [vmem:[#allocation8 + $0x320] ss:$16 sps:$4 sm:$0xff]  }
 0x108   :  { %2712 = vmatpush1.bf16.msra.mxu0 %v3533_v35  ;;  %v3590_v35 = vld [vmem:[#allocation8 + $0x2e8] ss:$16 sps:$4 sm:$0xff]  }
 0x109   :  { %2714 = vmatprep.subr.bf16.mxu0 %v3537_v36  ;;  %2840 = vmatpush1.bf16.msra.mxu1 %v3536_v42  ;;  %v3591_v36 = vld [vmem:[#allocation8 + $0x304] ss:$16 sps:$4 sm:$0xff]   ;;  %v3602_v42 = vld [vmem:[#allocation8 + $0x328] ss:$16 sps:$4 sm:$0xff]  }
 0x10a   :  { %2842 = vmatprep.subr.bf16.mxu1 %v3540_v43  ;;  %v3603_v43 = vld [vmem:[#allocation8 + $0x344] ss:$16 sps:$4 sm:$0xff]  }
 0x10c   :  { %2716 = vmatpush1.bf16.msra.mxu0 %v3539_v6  ;;  %v3596_v6 = vld [vmem:[#allocation8 + $0x308] ss:$16 sps:$4 sm:$0xff]  }
 0x10d   :  { %2718 = vmatprep.subr.bf16.mxu0 %v3543_v39  ;;  %2844 = vmatpush1.bf16.msra.mxu1 %v3542_v44  ;;  %v3597_v39 = vld [vmem:[#allocation8 + $0x324] ss:$16 sps:$4 sm:$0xff]   ;;  %v3606_v44 = vld [vmem:[#allocation8 + $0x34c] ss:$16 sps:$4 sm:$0xff]  }
 0x10e   :  { %2846 = vmatprep.subr.bf16.mxu1 %v3546_v45  ;;  %v3605_v45 = vld [vmem:[#allocation8 + $0x340] ss:$16 sps:$4 sm:$0xff]  }
 0x162   :  { %v962_v53 = vpop.f32.mrb[0].mxu0  ;;  %v1003_v12 = vpop.f32.mrb[0].mxu1 }
 0x163   :  { %v963_v54 = vadd.f32 %v962_v53, %v251_v51  ;;  %v964_v55 = vpop.f32.mrb[1].mxu0  ;;  %v4129_v13 = vadd.f32 %v1003_v12, %v259_v4  ;;  %v1005_v14 = vpop.f32.mrb[1].mxu1  ;;  %v3609_v51 = vld [vmem:[#allocation8 + $0x364] ss:$16 sps:$4 sm:$0xff]   ;;  %v3611_v53 = vld [vmem:[#allocation8 + $0x360] ss:$16 sps:$4 sm:$0xff]  }
 0x164   :  { %v965_v56 = vadd.f32 %v964_v55, %v255_v52  ;;  %v966_v57 = vpop.f32.mrb[2].mxu0  ;;  %v1006_v15 = vadd.f32 %v1005_v14, %v263_v5  ;;  %v1007_v16 = vpop.f32.mrb[2].mxu1  ;;  %v3612_v52 = vld [vmem:[#allocation8 + $0x36c] ss:$16 sps:$4 sm:$0xff]   ;;  %v3615_v55 = vld [vmem:[#allocation8 + $0x384] ss:$16 sps:$4 sm:$0xff]  }
 0x165   :  { %1092 = vst [vmem:[#allocation11] sm:$0xff] %v963_v54  ;;  %v967_v60 = vpop.f32.mrb[3].mxu0  ;;  %1094 = vst [vmem:[#allocation11 + $0x10] sm:$0xff] %v4129_v13  ;;  %v1008_v19 = vpop.f32.mrb[3].mxu1  ;;  %v3617_v57 = vld [vmem:[#allocation8 + $0x380] ss:$16 sps:$4 sm:$0xff]  }
 0x166   :  { %1093 = vst [vmem:[#allocation11 + $0x8] sm:$0xff] %v965_v56  ;;  %1570 = vmatprep.mubr.f32.mxu0 %v965_v56  ;;  %1712 = vmatprep.mubr.f32.mxu1 %v965_v56  ;;  %1095 = vst [vmem:[#allocation11 + $0x18] sm:$0xff] %v1006_v15  ;;  %v3618_v56 = vld [vmem:[#allocation8 + $0x38c] ss:$16 sps:$4 sm:$0xff]   ;;  %v3632_v4 = vld [vmem:[#allocation8 + $0x3c8] ss:$16 sps:$4 sm:$0xff]  }
 0x167   :  { %1571 = vmatmul.mubr.f32.vlgmr.msra.gmra.mrb[8].mxu0 %v963_v54  ;;  %1713 = vmatmul.mubr.f32.vlgmr.msra.gmra.mrb[8].mxu1 %v963_v54  ;;  %v3614_v54 = vld [vmem:[#allocation8 + $0x368] ss:$16 sps:$4 sm:$0xff]   ;;  %v3624_v60 = vld [vmem:[#allocation8 + $0x3ac] ss:$16 sps:$4 sm:$0xff]   ;;  %v270_v5 = vsub.s32 5, %v4105_v47 }
 0x168   :  { %2720 = vmatpush1.bf16.msra.mxu0 %v3545_v58  ;;  %2848 = vmatpush1.bf16.msra.mxu1 %v3548_v59  ;;  %v3620_v58 = vld [vmem:[#allocation8 + $0x388] ss:$16 sps:$4 sm:$0xff]   ;;  %v3621_v59 = vld [vmem:[#allocation8 + $0x3a4] ss:$16 sps:$4 sm:$0xff]   ;;  %v3642_v16 = vld [vmem:[#allocation8 + $0x40c] ss:$16 sps:$4 sm:$0xff]  }
 0x169   :  { %2722 = vmatprep.subr.bf16.mxu0 %v3549_v61  ;;  %2850 = vmatprep.subr.bf16.mxu1 %v3552_v62  ;;  %v3623_v61 = vld [vmem:[#allocation8 + $0x3a0] ss:$16 sps:$4 sm:$0xff]   ;;  %v3626_v62 = vld [vmem:[#allocation8 + $0x3a8] ss:$16 sps:$4 sm:$0xff]   ;;  %v271_v14 = vrot.slane %v4110_v49, %v270_v5  ;;  %v3696_v5 = vld [vmem:[#allocation8 + $0x52c] ss:$16 sps:$4 sm:$0xff]  }
 0x16a   :  { %1641 = vmatprep.mubr.f32.mxu0 %v1006_v15  ;;  %1783 = vmatprep.mubr.f32.mxu1 %v1006_v15  ;;  %v3638_v12 = vld [vmem:[#allocation8 + $0x3e8] ss:$16 sps:$4 sm:$0xff]   ;;  %v3639_v15 = vld [vmem:[#allocation8 + $0x404] ss:$16 sps:$4 sm:$0xff]  }
 0x16c   :  { %2724 = vmatpush1.bf16.msra.mxu0 %v3551_v1  ;;  %2852 = vmatpush1.bf16.msra.mxu1 %v3554_v40  ;;  %v3627_v1 = vld [vmem:[#allocation8 + $0x3c4] ss:$16 sps:$4 sm:$0xff]   ;;  %v3630_v40 = vld [vmem:[#allocation8 + $0x3cc] ss:$16 sps:$4 sm:$0xff]  }
 0x16d   :  { %2726 = vmatprep.subr.bf16.mxu0 %v3555_v2  ;;  %2854 = vmatprep.subr.bf16.mxu1 %v3558_v3  ;;  %v266_v2 = vsub.s32 4, %v4105_v47  ;;  %v3629_v3 = vld [vmem:[#allocation8 + $0x3c0] ss:$16 sps:$4 sm:$0xff]  }
 0x170   :  { %2728 = vmatpush1.bf16.msra.mxu0 %v3557_v8  ;;  %2856 = vmatpush1.bf16.msra.mxu1 %v3560_v9  ;;  %v3633_v8 = vld [vmem:[#allocation8 + $0x3e4] ss:$16 sps:$4 sm:$0xff]   ;;  %v3636_v9 = vld [vmem:[#allocation8 + $0x3ec] ss:$16 sps:$4 sm:$0xff]  }
 0x171   :  { %2730 = vmatprep.subr.bf16.mxu0 %v3561_v10  ;;  %2858 = vmatprep.subr.bf16.mxu1 %v3564_v11  ;;  %v267_v10 = vrot.slane %v4110_v49, %v266_v2  ;;  %v3635_v11 = vld [vmem:[#allocation8 + $0x3e0] ss:$16 sps:$4 sm:$0xff]  }
 0x172   :  { %v3689_v2 = vld [vmem:[#allocation8 + $0x500] ss:$16 sps:$4 sm:$0xff]  }
 0x174   :  { %2732 = vmatpush1.bf16.msra.mxu0 %v3563_v17  ;;  %2860 = vmatpush1.bf16.msra.mxu1 %v3566_v18 }
 0x175   :  { %2734 = vmatprep.subr.bf16.mxu0 %v3567_v20  ;;  %2862 = vmatprep.subr.bf16.mxu1 %v3570_v21  ;;  %v3641_v20 = vld [vmem:[#allocation8 + $0x400] ss:$16 sps:$4 sm:$0xff]   ;;  %v3644_v21 = vld [vmem:[#allocation8 + $0x408] ss:$16 sps:$4 sm:$0xff]  }
 0x178   :  { %2736 = vmatpush1.bf16.msra.mxu0 %v3569_v22  ;;  %2864 = vmatpush1.bf16.msra.mxu1 %v3572_v23 }
 0x179   :  { %2738 = vmatprep.subr.bf16.mxu0 %v3573_v24  ;;  %2866 = vmatprep.subr.bf16.mxu1 %v3576_v25  ;;  %v3645_v24 = vld [vmem:[#allocation8 + $0x424] ss:$16 sps:$4 sm:$0xff]   ;;  %v3648_v25 = vld [vmem:[#allocation8 + $0x42c] ss:$16 sps:$4 sm:$0xff]  }
 0x17c   :  { %2740 = vmatpush1.bf16.msra.mxu0 %v3575_v26  ;;  %2868 = vmatpush1.bf16.msra.mxu1 %v3578_v27  ;;  %v274_v27 = vsub.s32 6, %v4105_v47 }
 0x17d   :  { %2742 = vmatprep.subr.bf16.mxu0 %v3579_v28  ;;  %2870 = vmatprep.subr.bf16.mxu1 %v3582_v29  ;;  %v278_v28 = vsub.s32 7, %v4105_v47  ;;  %v3647_v29 = vld [vmem:[#allocation8 + $0x420] ss:$16 sps:$4 sm:$0xff]   ;;  %v3657_v47 = vld [vmem:[#allocation8 + $0x464] ss:$16 sps:$4 sm:$0xff]  }
 0x180   :  { %2744 = vmatpush1.bf16.msra.mxu0 %v3581_v30  ;;  %2872 = vmatpush1.bf16.msra.mxu1 %v3584_v31  ;;  %v3650_v30 = vld [vmem:[#allocation8 + $0x428] ss:$16 sps:$4 sm:$0xff]   ;;  %v3651_v31 = vld [vmem:[#allocation8 + $0x444] ss:$16 sps:$4 sm:$0xff]  }
 0x181   :  { %2746 = vmatprep.subr.bf16.mxu0 %v3585_v32  ;;  %2874 = vmatprep.subr.bf16.mxu1 %v3588_v33  ;;  %v3654_v32 = vld [vmem:[#allocation8 + $0x44c] ss:$16 sps:$4 sm:$0xff]   ;;  %v275_v33 = vrot.slane %v4110_v49, %v274_v27  ;;  %v3722_v27 = vld [vmem:[#allocation8 + $0x5a8] ss:$16 sps:$4 sm:$0xff]  }
 0x184   :  { %2748 = vmatpush1.bf16.msra.mxu0 %v3587_v34  ;;  %2876 = vmatpush1.bf16.msra.mxu1 %v3590_v35  ;;  %v279_v34 = vrot.slane %v4110_v49, %v278_v28  ;;  %v3653_v35 = vld [vmem:[#allocation8 + $0x440] ss:$16 sps:$4 sm:$0xff]   ;;  %v3723_v28 = vld [vmem:[#allocation8 + $0x5c4] ss:$16 sps:$4 sm:$0xff]  }
 0x185   :  { %2750 = vmatprep.subr.bf16.mxu0 %v3591_v36  ;;  %2878 = vmatprep.subr.bf16.mxu1 %v3594_v37  ;;  %v3660_v36 = vld [vmem:[#allocation8 + $0x46c] ss:$16 sps:$4 sm:$0xff]  }
 0x188   :  { %2752 = vmatpush1.bf16.msra.mxu0 %v3593_v38  ;;  %2880 = vmatpush1.bf16.msra.mxu1 %v3596_v6 }
 0x189   :  { %2754 = vmatprep.subr.bf16.mxu0 %v3597_v39  ;;  %2882 = vmatprep.subr.bf16.mxu1 %v3600_v7 }
 0x18c   :  { %2756 = vmatpush1.bf16.msra.mxu0 %v3599_v41  ;;  %2884 = vmatpush1.bf16.msra.mxu1 %v3602_v42  ;;  %v3659_v41 = vld [vmem:[#allocation8 + $0x460] ss:$16 sps:$4 sm:$0xff]   ;;  %v3662_v42 = vld [vmem:[#allocation8 + $0x468] ss:$16 sps:$4 sm:$0xff]  }
 0x18d   :  { %2758 = vmatprep.subr.bf16.mxu0 %v3603_v43  ;;  %2886 = vmatprep.subr.bf16.mxu1 %v3606_v44  ;;  %v3663_v43 = vld [vmem:[#allocation8 + $0x484] ss:$16 sps:$4 sm:$0xff]   ;;  %v3666_v44 = vld [vmem:[#allocation8 + $0x48c] ss:$16 sps:$4 sm:$0xff]  }
 0x190   :  { %2760 = vmatpush1.bf16.msra.mxu0 %v3605_v45  ;;  %2888 = vmatpush1.bf16.msra.mxu1 %v3608_v46  ;;  %v3665_v45 = vld [vmem:[#allocation8 + $0x480] ss:$16 sps:$4 sm:$0xff]   ;;  %v3668_v46 = vld [vmem:[#allocation8 + $0x488] ss:$16 sps:$4 sm:$0xff]  }
 0x191   :  { %2762 = vmatprep.subr.bf16.mxu0 %v3609_v51  ;;  %2890 = vmatprep.subr.bf16.mxu1 %v3612_v52  ;;  %v3669_v51 = vld [vmem:[#allocation8 + $0x4a4] ss:$16 sps:$4 sm:$0xff]   ;;  %v3672_v52 = vld [vmem:[#allocation8 + $0x4ac] ss:$16 sps:$4 sm:$0xff]  }
 0x194   :  { %2764 = vmatpush1.bf16.msra.mxu0 %v3611_v53  ;;  %2892 = vmatpush1.bf16.msra.mxu1 %v3614_v54  ;;  %v3671_v53 = vld [vmem:[#allocation8 + $0x4a0] ss:$16 sps:$4 sm:$0xff]   ;;  %v3674_v54 = vld [vmem:[#allocation8 + $0x4a8] ss:$16 sps:$4 sm:$0xff]  }
 0x195   :  { %2766 = vmatprep.subr.bf16.mxu0 %v3615_v55  ;;  %2894 = vmatprep.subr.bf16.mxu1 %v3618_v56  ;;  %v3675_v55 = vld [vmem:[#allocation8 + $0x4c4] ss:$16 sps:$4 sm:$0xff]   ;;  %v3678_v56 = vld [vmem:[#allocation8 + $0x4cc] ss:$16 sps:$4 sm:$0xff]  }
 0x198   :  { %2768 = vmatpush1.bf16.msra.mxu0 %v3617_v57  ;;  %2896 = vmatpush1.bf16.msra.mxu1 %v3620_v58  ;;  %v3677_v57 = vld [vmem:[#allocation8 + $0x4c0] ss:$16 sps:$4 sm:$0xff]   ;;  %v3680_v58 = vld [vmem:[#allocation8 + $0x4c8] ss:$16 sps:$4 sm:$0xff]  }
 0x199   :  { %2770 = vmatprep.subr.bf16.mxu0 %v3621_v59  ;;  %2898 = vmatprep.subr.bf16.mxu1 %v3624_v60  ;;  %v3681_v59 = vld [vmem:[#allocation8 + $0x4e4] ss:$16 sps:$4 sm:$0xff]   ;;  %v3684_v60 = vld [vmem:[#allocation8 + $0x4ec] ss:$16 sps:$4 sm:$0xff]  }
 0x19c   :  { %2772 = vmatpush1.bf16.msra.mxu0 %v3623_v61  ;;  %2900 = vmatpush1.bf16.msra.mxu1 %v3626_v62  ;;  %v3683_v61 = vld [vmem:[#allocation8 + $0x4e0] ss:$16 sps:$4 sm:$0xff]   ;;  %v3686_v62 = vld [vmem:[#allocation8 + $0x4e8] ss:$16 sps:$4 sm:$0xff]  }
 0x19d   :  { %2774 = vmatprep.subr.bf16.mxu0 %v3627_v1  ;;  %2902 = vmatprep.subr.bf16.mxu1 %v3630_v40  ;;  %v3687_v1 = vld [vmem:[#allocation8 + $0x504] ss:$16 sps:$4 sm:$0xff]   ;;  %v3690_v40 = vld [vmem:[#allocation8 + $0x50c] ss:$16 sps:$4 sm:$0xff]  }
 0x1a0   :  { %2776 = vmatpush1.bf16.msra.mxu0 %v3629_v3  ;;  %2904 = vmatpush1.bf16.msra.mxu1 %v3632_v4  ;;  %v3692_v3 = vld [vmem:[#allocation8 + $0x508] ss:$16 sps:$4 sm:$0xff]   ;;  %v3693_v4 = vld [vmem:[#allocation8 + $0x524] ss:$16 sps:$4 sm:$0xff]  }
 0x1a1   :  { %2778 = vmatprep.subr.bf16.mxu0 %v3633_v8  ;;  %2906 = vmatprep.subr.bf16.mxu1 %v3636_v9  ;;  %v3695_v8 = vld [vmem:[#allocation8 + $0x520] ss:$16 sps:$4 sm:$0xff]   ;;  %v3698_v9 = vld [vmem:[#allocation8 + $0x528] ss:$16 sps:$4 sm:$0xff]  }
 0x1a2   :  { %v1044_v17 = vpop.f32.mrb[4].mxu0 }
 0x1a3   :  { %v4136_v18 = vadd.f32 %v1044_v17, %v267_v10  ;;  %v1046_v19 = vpop.f32.mrb[5].mxu0  ;;  %v1085_v37 = vpop.f32.mrb[4].mxu1  ;;  %v3699_v10 = vld [vmem:[#allocation8 + $0x544] ss:$16 sps:$4 sm:$0xff]   ;;  %v3707_v17 = vld [vmem:[#allocation8 + $0x560] ss:$16 sps:$4 sm:$0xff]  }
 0x1a4   :  { %2780 = vmatpush1.bf16.msra.mxu0 %v3635_v11  ;;  %2908 = vmatpush1.bf16.msra.mxu1 %v3638_v12  ;;  %v1047_v22 = vadd.f32 %v1046_v19, %v271_v14  ;;  %v1048_v23 = vpop.f32.mrb[6].mxu0  ;;  %v4145_v38 = vadd.f32 %v1085_v37, %v275_v33  ;;  %v1087_v6 = vpop.f32.mrb[5].mxu1  ;;  %v3702_v11 = vld [vmem:[#allocation8 + $0x54c] ss:$16 sps:$4 sm:$0xff]   ;;  %v3701_v12 = vld [vmem:[#allocation8 + $0x540] ss:$16 sps:$4 sm:$0xff]  }
 0x1a5   :  { %2910 = vmatprep.subr.bf16.mxu0 %v3639_v15  ;;  %3038 = vmatprep.subr.bf16.mxu1 %v3642_v16  ;;  %1096 = vst [vmem:[#allocation11 + $0x20] sm:$0xff] %v4136_v18  ;;  %v1049_v26 = vpop.f32.mrb[7].mxu0  ;;  %v4147_v39 = vadd.f32 %v1087_v6, %v279_v34  ;;  %v1089_v7 = vpop.f32.mrb[6].mxu1  ;;  %v3704_v14 = vld [vmem:[#allocation8 + $0x548] ss:$16 sps:$4 sm:$0xff]  }
 0x1a6   :  { %1097 = vst [vmem:[#allocation11 + $0x28] sm:$0xff] %v1047_v22  ;;  %1098 = vst [vmem:[#allocation11 + $0x30] sm:$0xff] %v4145_v38  ;;  %v1090_v49 = vpop.f32.mrb[7].mxu1  ;;  %v3705_v15 = vld [vmem:[#allocation8 + $0x564] ss:$16 sps:$4 sm:$0xff]  }
 0x1a7   :  { %1642 = vmatmul.mubr.f32.vlgmr.msra.gmra.mrb[8].mxu0 %v4129_v13  ;;  %1784 = vmatmul.mubr.f32.vlgmr.msra.gmra.mrb[8].mxu1 %v4129_v13  ;;  %v3656_v13 = vld [vmem:[#allocation8 + $0x448] ss:$16 sps:$4 sm:$0xff]   ;;  %1099 = vst [vmem:[#allocation11 + $0x38] sm:$0xff] %v4147_v39  ;;  %v3708_v16 = vld [vmem:[#allocation8 + $0x56c] ss:$16 sps:$4 sm:$0xff]  }
 0x1a8   :  { %2912 = vmatpush1.bf16.msra.mxu0 %v3641_v20  ;;  %3040 = vmatpush1.bf16.msra.mxu1 %v3644_v21  ;;  %v3710_v19 = vld [vmem:[#allocation8 + $0x568] ss:$16 sps:$4 sm:$0xff]   ;;  %v3711_v20 = vld [vmem:[#allocation8 + $0x584] ss:$16 sps:$4 sm:$0xff]   ;;  %v3714_v21 = vld [vmem:[#allocation8 + $0x58c] ss:$16 sps:$4 sm:$0xff]  }
 0x1a9   :  { %2914 = vmatprep.subr.bf16.mxu0 %v3645_v24  ;;  %3042 = vmatprep.subr.bf16.mxu1 %v3648_v25  ;;  %v3716_v23 = vld [vmem:[#allocation8 + $0x588] ss:$16 sps:$4 sm:$0xff]   ;;  %v3717_v24 = vld [vmem:[#allocation8 + $0x5a4] ss:$16 sps:$4 sm:$0xff]   ;;  %v3720_v25 = vld [vmem:[#allocation8 + $0x5ac] ss:$16 sps:$4 sm:$0xff]  }
 0x1aa   :  { %2266 = vmatprep.mubr.f32.mxu0 %v1047_v22  ;;  %2408 = vmatprep.mubr.f32.mxu1 %v1047_v22  ;;  %v3713_v22 = vld [vmem:[#allocation8 + $0x580] ss:$16 sps:$4 sm:$0xff]   ;;  %v3732_v33 = vld [vmem:[#allocation8 + $0x5ec] ss:$16 sps:$4 sm:$0xff]   ;;  %v3740_v37 = vld [vmem:[#allocation8 + $0x608] ss:$16 sps:$4 sm:$0xff]  }
 0x1ab   :  { %v3719_v26 = vld [vmem:[#allocation8 + $0x5a0] ss:$16 sps:$4 sm:$0xff]   ;;  %v3741_v6 = vld [vmem:[#allocation8 + $0x624] ss:$16 sps:$4 sm:$0xff]   ;;  %v3744_v7 = vld [vmem:[#allocation8 + $0x62c] ss:$16 sps:$4 sm:$0xff]  }
 0x1ac   :  { %2916 = vmatpush1.bf16.msra.mxu0 %v3647_v29  ;;  %3044 = vmatpush1.bf16.msra.mxu1 %v3650_v30  ;;  %v3726_v29 = vld [vmem:[#allocation8 + $0x5cc] ss:$16 sps:$4 sm:$0xff]   ;;  %v3725_v30 = vld [vmem:[#allocation8 + $0x5c0] ss:$16 sps:$4 sm:$0xff]   ;;  %v3747_v49 = vld [vmem:[#allocation8 + $0x644] ss:$16 sps:$4 sm:$0xff]  }
 0x1ad   :  { %2918 = vmatprep.subr.bf16.mxu0 %v3651_v31  ;;  %3046 = vmatprep.subr.bf16.mxu1 %v3654_v32  ;;  %v3728_v31 = vld [vmem:[#allocation8 + $0x5c8] ss:$16 sps:$4 sm:$0xff]   ;;  %v3729_v32 = vld [vmem:[#allocation8 + $0x5e4] ss:$16 sps:$4 sm:$0xff]   ;;  %v3731_v34 = vld [vmem:[#allocation8 + $0x5e0] ss:$16 sps:$4 sm:$0xff]  }
 0x1b0   :  { %2920 = vmatpush1.bf16.msra.mxu0 %v3653_v35  ;;  %3048 = vmatpush1.bf16.msra.mxu1 %v3656_v13  ;;  %v3734_v35 = vld [vmem:[#allocation8 + $0x5e8] ss:$16 sps:$4 sm:$0xff]   ;;  %v3735_v13 = vld [vmem:[#allocation8 + $0x604] ss:$16 sps:$4 sm:$0xff]  }
 0x1b1   :  { %2922 = vmatprep.subr.bf16.mxu0 %v3657_v47  ;;  %3050 = vmatprep.subr.bf16.mxu1 %v3660_v36  ;;  %v3738_v47 = vld [vmem:[#allocation8 + $0x60c] ss:$16 sps:$4 sm:$0xff]   ;;  %v3737_v36 = vld [vmem:[#allocation8 + $0x600] ss:$16 sps:$4 sm:$0xff]  }
 0x1b4   :  { %2924 = vmatpush1.bf16.msra.mxu0 %v3659_v41  ;;  %3052 = vmatpush1.bf16.msra.mxu1 %v3662_v42  ;;  %v3743_v41 = vld [vmem:[#allocation8 + $0x620] ss:$16 sps:$4 sm:$0xff]   ;;  %v3746_v42 = vld [vmem:[#allocation8 + $0x628] ss:$16 sps:$4 sm:$0xff]  }
 0x1b5   :  { %2926 = vmatprep.subr.bf16.mxu0 %v3663_v43  ;;  %3054 = vmatprep.subr.bf16.mxu1 %v3666_v44  ;;  %v3750_v43 = vld [vmem:[#allocation8 + $0x64c] ss:$16 sps:$4 sm:$0xff]   ;;  %v3749_v44 = vld [vmem:[#allocation8 + $0x640] ss:$16 sps:$4 sm:$0xff]  }
 0x1b8   :  { %2928 = vmatpush1.bf16.msra.mxu0 %v3665_v45  ;;  %3056 = vmatpush1.bf16.msra.mxu1 %v3668_v46  ;;  %v3752_v45 = vld [vmem:[#allocation8 + $0x648] ss:$16 sps:$4 sm:$0xff]   ;;  %v3753_v46 = vld [vmem:[#allocation8 + $0x664] ss:$16 sps:$4 sm:$0xff]  }
 0x1b9   :  { %2930 = vmatprep.subr.bf16.mxu0 %v3669_v51  ;;  %3058 = vmatprep.subr.bf16.mxu1 %v3672_v52  ;;  %v3755_v51 = vld [vmem:[#allocation8 + $0x660] ss:$16 sps:$4 sm:$0xff]   ;;  %v3758_v52 = vld [vmem:[#allocation8 + $0x668] ss:$16 sps:$4 sm:$0xff]  }
 0x1bc   :  { %2932 = vmatpush1.bf16.msra.mxu0 %v3671_v53  ;;  %3060 = vmatpush1.bf16.msra.mxu1 %v3674_v54  ;;  %v3759_v53 = vld [vmem:[#allocation8 + $0x684] ss:$16 sps:$4 sm:$0xff]   ;;  %v3762_v54 = vld [vmem:[#allocation8 + $0x68c] ss:$16 sps:$4 sm:$0xff]  }
 0x1bd   :  { %2934 = vmatprep.subr.bf16.mxu0 %v3675_v55  ;;  %3062 = vmatprep.subr.bf16.mxu1 %v3678_v56  ;;  %v3761_v55 = vld [vmem:[#allocation8 + $0x680] ss:$16 sps:$4 sm:$0xff]   ;;  %v3765_v56 = vld [vmem:[#allocation8 + $0x6a4] ss:$16 sps:$4 sm:$0xff]  }
 0x1c0   :  { %2936 = vmatpush1.bf16.msra.mxu0 %v3677_v57  ;;  %3064 = vmatpush1.bf16.msra.mxu1 %v3680_v58  ;;  %v3768_v57 = vld [vmem:[#allocation8 + $0x6ac] ss:$16 sps:$4 sm:$0xff]   ;;  %v3767_v58 = vld [vmem:[#allocation8 + $0x6a0] ss:$16 sps:$4 sm:$0xff]  }
 0x1c1   :  { %2938 = vmatprep.subr.bf16.mxu0 %v3681_v59  ;;  %3066 = vmatprep.subr.bf16.mxu1 %v3684_v60  ;;  %v3770_v59 = vld [vmem:[#allocation8 + $0x6a8] ss:$16 sps:$4 sm:$0xff]   ;;  %v3771_v60 = vld [vmem:[#allocation8 + $0x6c4] ss:$16 sps:$4 sm:$0xff]  }
 0x1c4   :  { %2940 = vmatpush1.bf16.msra.mxu0 %v3683_v61  ;;  %3068 = vmatpush1.bf16.msra.mxu1 %v3686_v62  ;;  %v3774_v61 = vld [vmem:[#allocation8 + $0x6cc] ss:$16 sps:$4 sm:$0xff]   ;;  %v3773_v62 = vld [vmem:[#allocation8 + $0x6c0] ss:$16 sps:$4 sm:$0xff]  }
 0x1c5   :  { %2942 = vmatprep.subr.bf16.mxu0 %v3687_v1  ;;  %3070 = vmatprep.subr.bf16.mxu1 %v3690_v40  ;;  %v3776_v1 = vld [vmem:[#allocation8 + $0x6c8] ss:$16 sps:$4 sm:$0xff]   ;;  %v3777_v40 = vld [vmem:[#allocation8 + $0x6e4] ss:$16 sps:$4 sm:$0xff]  }
 0x1c8   :  { %2944 = vmatpush1.bf16.msra.mxu0 %v3689_v2  ;;  %3072 = vmatpush1.bf16.msra.mxu1 %v3692_v3  ;;  %v3780_v2 = vld [vmem:[#allocation8 + $0x6ec] ss:$16 sps:$4 sm:$0xff]   ;;  %v3779_v3 = vld [vmem:[#allocation8 + $0x6e0] ss:$16 sps:$4 sm:$0xff]  }
 0x1c9   :  { %2946 = vmatprep.subr.bf16.mxu0 %v3693_v4  ;;  %3074 = vmatprep.subr.bf16.mxu1 %v3696_v5  ;;  %v3782_v4 = vld [vmem:[#allocation8 + $0x6e8] ss:$16 sps:$4 sm:$0xff]   ;;  %v3783_v5 = vld [vmem:[#allocation8 + $0x704] ss:$16 sps:$4 sm:$0xff]  }
 0x1cc   :  { %2948 = vmatpush1.bf16.msra.mxu0 %v3695_v8  ;;  %3076 = vmatpush1.bf16.msra.mxu1 %v3698_v9  ;;  %v3786_v8 = vld [vmem:[#allocation8 + $0x70c] ss:$16 sps:$4 sm:$0xff]   ;;  %v3785_v9 = vld [vmem:[#allocation8 + $0x700] ss:$16 sps:$4 sm:$0xff]  }
 0x1cd   :  { %2950 = vmatprep.subr.bf16.mxu0 %v3699_v10  ;;  %3078 = vmatprep.subr.bf16.mxu1 %v3702_v11  ;;  %v3788_v10 = vld [vmem:[#allocation8 + $0x708] ss:$16 sps:$4 sm:$0xff]   ;;  %v3789_v11 = vld [vmem:[#allocation8 + $0x724] ss:$16 sps:$4 sm:$0xff]  }
 0x1d0   :  { %2952 = vmatpush1.bf16.msra.mxu0 %v3701_v12  ;;  %3080 = vmatpush1.bf16.msra.mxu1 %v3704_v14  ;;  %v3792_v12 = vld [vmem:[#allocation8 + $0x72c] ss:$16 sps:$4 sm:$0xff]   ;;  %v3791_v14 = vld [vmem:[#allocation8 + $0x720] ss:$16 sps:$4 sm:$0xff]  }
 0x1d1   :  { %2954 = vmatprep.subr.bf16.mxu0 %v3705_v15  ;;  %3082 = vmatprep.subr.bf16.mxu1 %v3708_v16  ;;  %v3794_v15 = vld [vmem:[#allocation8 + $0x728] ss:$16 sps:$4 sm:$0xff]   ;;  %v3795_v16 = vld [vmem:[#allocation8 + $0x744] ss:$16 sps:$4 sm:$0xff]  }
 0x1d4   :  { %2956 = vmatpush1.bf16.msra.mxu0 %v3707_v17  ;;  %3084 = vmatpush1.bf16.msra.mxu1 %v3710_v19  ;;  %v3798_v17 = vld [vmem:[#allocation8 + $0x74c] ss:$16 sps:$4 sm:$0xff]   ;;  %v3797_v19 = vld [vmem:[#allocation8 + $0x740] ss:$16 sps:$4 sm:$0xff]  }
 0x1d5   :  { %2958 = vmatprep.subr.bf16.mxu0 %v3711_v20  ;;  %3086 = vmatprep.subr.bf16.mxu1 %v3714_v21  ;;  %v3800_v20 = vld [vmem:[#allocation8 + $0x748] ss:$16 sps:$4 sm:$0xff]   ;;  %v3801_v21 = vld [vmem:[#allocation8 + $0x764] ss:$16 sps:$4 sm:$0xff]  }
 0x1d8   :  { %2960 = vmatpush1.bf16.msra.mxu0 %v3713_v22  ;;  %3088 = vmatpush1.bf16.msra.mxu1 %v3716_v23  ;;  %v3804_v22 = vld [vmem:[#allocation8 + $0x76c] ss:$16 sps:$4 sm:$0xff]   ;;  %v3803_v23 = vld [vmem:[#allocation8 + $0x760] ss:$16 sps:$4 sm:$0xff]  }
 0x1d9   :  { %2962 = vmatprep.subr.bf16.mxu0 %v3717_v24  ;;  %3090 = vmatprep.subr.bf16.mxu1 %v3720_v25  ;;  %v3806_v24 = vld [vmem:[#allocation8 + $0x768] ss:$16 sps:$4 sm:$0xff]   ;;  %v3807_v25 = vld [vmem:[#allocation8 + $0x784] ss:$16 sps:$4 sm:$0xff]  }
 0x1dc   :  { %2964 = vmatpush1.bf16.msra.mxu0 %v3719_v26  ;;  %3092 = vmatpush1.bf16.msra.mxu1 %v3722_v27  ;;  %v3810_v26 = vld [vmem:[#allocation8 + $0x78c] ss:$16 sps:$4 sm:$0xff]   ;;  %v3809_v27 = vld [vmem:[#allocation8 + $0x780] ss:$16 sps:$4 sm:$0xff]  }
 0x1dd   :  { %2966 = vmatprep.subr.bf16.mxu0 %v3723_v28  ;;  %3094 = vmatprep.subr.bf16.mxu1 %v3726_v29  ;;  %v3812_v28 = vld [vmem:[#allocation8 + $0x788] ss:$16 sps:$4 sm:$0xff]   ;;  %v3813_v29 = vld [vmem:[#allocation8 + $0x7a4] ss:$16 sps:$4 sm:$0xff]  }
 0x1e0   :  { %2968 = vmatpush1.bf16.msra.mxu0 %v3725_v30  ;;  %3096 = vmatpush1.bf16.msra.mxu1 %v3728_v31  ;;  %v3816_v30 = vld [vmem:[#allocation8 + $0x7ac] ss:$16 sps:$4 sm:$0xff]   ;;  %v3815_v31 = vld [vmem:[#allocation8 + $0x7a0] ss:$16 sps:$4 sm:$0xff]  }
 0x1e1   :  { %2970 = vmatprep.subr.bf16.mxu0 %v3729_v32  ;;  %3098 = vmatprep.subr.bf16.mxu1 %v3732_v33  ;;  %v3818_v32 = vld [vmem:[#allocation8 + $0x7a8] ss:$16 sps:$4 sm:$0xff]   ;;  %v3819_v33 = vld [vmem:[#allocation8 + $0x7c4] ss:$16 sps:$4 sm:$0xff]  }
 0x1e4   :  { %2972 = vmatpush1.bf16.msra.mxu0 %v3731_v34  ;;  %3100 = vmatpush1.bf16.msra.mxu1 %v3734_v35  ;;  %v3822_v34 = vld [vmem:[#allocation8 + $0x7cc] ss:$16 sps:$4 sm:$0xff]   ;;  %v3821_v35 = vld [vmem:[#allocation8 + $0x7c0] ss:$16 sps:$4 sm:$0xff]  }
 0x1e5   :  { %2974 = vmatprep.subr.bf16.mxu0 %v3735_v13  ;;  %3102 = vmatprep.subr.bf16.mxu1 %v3738_v47  ;;  %v3824_v13 = vld [vmem:[#allocation8 + $0x7c8] ss:$16 sps:$4 sm:$0xff]   ;;  %v3825_v47 = vld [vmem:[#allocation8 + $0x7e4] ss:$16 sps:$4 sm:$0xff]  }
 0x1e7   :  { %2267 = vmatmul.mubr.f32.vlgmr.msra.gmra.mrb[10].mxu0 %v4136_v18  ;;  %2409 = vmatmul.mubr.f32.vlgmr.msra.gmra.mrb[10].mxu1 %v4136_v18  ;;  %v3756_v18 = vld [vmem:[#allocation8 + $0x66c] ss:$16 sps:$4 sm:$0xff]  }
 0x1e8   :  { %2976 = vmatpush1.bf16.msra.mxu0 %v3737_v36  ;;  %3104 = vmatpush1.bf16.msra.mxu1 %v3740_v37  ;;  %v3828_v36 = vld [vmem:[#allocation8 + $0x7ec] ss:$16 sps:$4 sm:$0xff]   ;;  %v3827_v37 = vld [vmem:[#allocation8 + $0x7e0] ss:$16 sps:$4 sm:$0xff]  }
 0x1e9   :  { %2978 = vmatprep.subr.bf16.mxu0 %v3741_v6  ;;  %3106 = vmatprep.subr.bf16.mxu1 %v3744_v7  ;;  %v3830_v6 = vld [vmem:[#allocation8 + $0x7e8] ss:$16 sps:$4 sm:$0xff]  }
 0x1ea   :  { %2337 = vmatprep.mubr.f32.mxu0 %v4147_v39  ;;  %2479 = vmatprep.mubr.f32.mxu1 %v4147_v39  ;;  %v3764_v39 = vld [vmem:[#allocation8 + $0x688] ss:$16 sps:$4 sm:$0xff]  }
 0x1eb   :  { %v1484_v7 = vld [vmem:[%s4202_s4] sm:$0xf] }
 0x1ec   :  { %2980 = vmatpush1.bf16.msra.mxu0 %v3743_v41  ;;  %3108 = vmatpush1.bf16.msra.mxu1 %v3746_v42  ;;  %v1489_v41 = vrot.slane %v1484_v7, %v4108_v48  ;;  %v1497_v42 = vrot.slane %v1484_v7, %v4120_v63 }
 0x1ed   :  { %2982 = vmatprep.subr.bf16.mxu0 %v3747_v49  ;;  %3110 = vmatprep.subr.bf16.mxu1 %v3750_v43  ;;  %v1493_v49 = vrot.slane %v1484_v7, %v4113_v50  ;;  %v1501_v43 = vrot.slane %v1484_v7, %v4123_v0 }
 0x1f0   :  { %2984 = vmatpush1.bf16.msra.mxu0 %v3749_v44  ;;  %3112 = vmatpush1.bf16.msra.mxu1 %v3752_v45 }
 0x1f1   :  { %2986 = vmatprep.subr.bf16.mxu0 %v3753_v46  ;;  %3114 = vmatprep.subr.bf16.mxu1 %v3756_v18 }
 0x1f4   :  { %2988 = vmatpush1.bf16.msra.mxu0 %v3755_v51  ;;  %3116 = vmatpush1.bf16.msra.mxu1 %v3758_v52 }
 0x1f5   :  { %2990 = vmatprep.subr.bf16.mxu0 %v3759_v53  ;;  %3118 = vmatprep.subr.bf16.mxu1 %v3762_v54 }
 0x1f8   :  { %2992 = vmatpush1.bf16.msra.mxu0 %v3761_v55  ;;  %3120 = vmatpush1.bf16.msra.mxu1 %v3764_v39 }
 0x1f9   :  { %2994 = vmatprep.subr.bf16.mxu0 %v3765_v56  ;;  %3122 = vmatprep.subr.bf16.mxu1 %v3768_v57 }
 0x1fc   :  { %2996 = vmatpush1.bf16.msra.mxu0 %v3767_v58  ;;  %3124 = vmatpush1.bf16.msra.mxu1 %v3770_v59 }
 0x1fd   :  { %2998 = vmatprep.subr.bf16.mxu0 %v3771_v60  ;;  %3126 = vmatprep.subr.bf16.mxu1 %v3774_v61 }
 0x200   :  { %3000 = vmatpush1.bf16.msra.mxu0 %v3773_v62  ;;  %3128 = vmatpush1.bf16.msra.mxu1 %v3776_v1 }
 0x201   :  { %3002 = vmatprep.subr.bf16.mxu0 %v3777_v40  ;;  %3130 = vmatprep.subr.bf16.mxu1 %v3780_v2 }
 0x204   :  { %3004 = vmatpush1.bf16.msra.mxu0 %v3779_v3  ;;  %3132 = vmatpush1.bf16.msra.mxu1 %v3782_v4 }
 0x205   :  { %3006 = vmatprep.subr.bf16.mxu0 %v3783_v5  ;;  %3134 = vmatprep.subr.bf16.mxu1 %v3786_v8 }
 0x208   :  { %3008 = vmatpush1.bf16.msra.mxu0 %v3785_v9  ;;  %3136 = vmatpush1.bf16.msra.mxu1 %v3788_v10 }
 0x209   :  { %3010 = vmatprep.subr.bf16.mxu0 %v3789_v11  ;;  %3138 = vmatprep.subr.bf16.mxu1 %v3792_v12 }
 0x20c   :  { %3012 = vmatpush1.bf16.msra.mxu0 %v3791_v14  ;;  %3140 = vmatpush1.bf16.msra.mxu1 %v3794_v15 }
 0x20d   :  { %3014 = vmatprep.subr.bf16.mxu0 %v3795_v16  ;;  %3142 = vmatprep.subr.bf16.mxu1 %v3798_v17 }
 0x210   :  { %3016 = vmatpush1.bf16.msra.mxu0 %v3797_v19  ;;  %3144 = vmatpush1.bf16.msra.mxu1 %v3800_v20 }
 0x211   :  { %3018 = vmatprep.subr.bf16.mxu0 %v3801_v21  ;;  %3146 = vmatprep.subr.bf16.mxu1 %v3804_v22 }
 0x214   :  { %3020 = vmatpush1.bf16.msra.mxu0 %v3803_v23  ;;  %3148 = vmatpush1.bf16.msra.mxu1 %v3806_v24 }
 0x215   :  { %3022 = vmatprep.subr.bf16.mxu0 %v3807_v25  ;;  %3150 = vmatprep.subr.bf16.mxu1 %v3810_v26 }
 0x218   :  { %3024 = vmatpush1.bf16.msra.mxu0 %v3809_v27  ;;  %3152 = vmatpush1.bf16.msra.mxu1 %v3812_v28 }
 0x219   :  { %3026 = vmatprep.subr.bf16.mxu0 %v3813_v29  ;;  %3154 = vmatprep.subr.bf16.mxu1 %v3816_v30 }
 0x21c   :  { %3028 = vmatpush1.bf16.msra.mxu0 %v3815_v31  ;;  %3156 = vmatpush1.bf16.msra.mxu1 %v3818_v32 }
 0x21d   :  { %3030 = vmatprep.subr.bf16.mxu0 %v3819_v33  ;;  %3158 = vmatprep.subr.bf16.mxu1 %v3822_v34 }
 0x220   :  { %3032 = vmatpush1.bf16.msra.mxu0 %v3821_v35  ;;  %3160 = vmatpush1.bf16.msra.mxu1 %v3824_v13 }
 0x221   :  { %3034 = vmatprep.subr.bf16.mxu0 %v3825_v47  ;;  %3162 = vmatprep.subr.bf16.mxu1 %v3828_v36 }
 0x224   :  { %3036 = vmatpush1.bf16.msra.mxu0 %v3827_v37  ;;  %3164 = vmatpush1.bf16.msra.mxu1 %v3830_v6 }
 0x227   :  { %2338 = vmatmul.mubr.f32.vlgmr.msra.gmra.mrb[10].mxu0 %v4145_v38  ;;  %2480 = vmatmul.mubr.f32.vlgmr.msra.gmra.mrb[10].mxu1 %v4145_v38 }
 0x27a   :  { %v1643_v44 = vpop.f32.mrb[8].mxu0  ;;  %v1785_v45 = vpop.f32.mrb[8].mxu1 }
 0x27b   :  { %v3165_v46 = vadd.f32 %v1643_v44, %v1489_v41  ;;  %v3167_v18 = vadd.f32 %v1785_v45, %v1497_v42  ;;  %v1645_v51 = vpop.f32.mrb[9].mxu0  ;;  %v1787_v52 = vpop.f32.mrb[9].mxu1 }
 0x27c   :  { %v3166_v53 = vadd.f32 %v1645_v51, %v1493_v49  ;;  %v3168_v38 = vadd.f32 %v1787_v52, %v1501_v43 }
 0x27d   :  { %1790 = vst [vmem:[#allocation10] sm:$0xff] %v3165_v46  ;;  %1792 = vst [vmem:[#allocation10 + $0x10] sm:$0xff] %v3167_v18 }
 0x27e   :  { %1791 = vst [vmem:[#allocation10 + $0x8] sm:$0xff] %v3166_v53  ;;  %1793 = vst [vmem:[#allocation10 + $0x18] sm:$0xff] %v3168_v38 }
 0x27f   :  { %3934 = shalt.err (!%p3931_p8)
}
 0x280   :  { %s3935_s29 = scalar_lea.hbm %s4204_s6, 1024 }
 0x281   :  { %p3936_p9 = scmp.ne.s32.totalorder %s4204_s6, %s3935_s29  ;;  %p3939_p10 = scmp.lt.u32.totalorder %s3935_s29, %s4204_s6 }
 0x283   :  { %p3941_p11 = pnand %p3939_p10, %p3936_p9 }
 0x285   :  { %3944 = shalt.err (!%p3941_p11)
}
 0x286   :  { %2512 = dma.vmem_to_hbm [thread:$0]  %s2510_s25, 1024, %s4204_s6, [#allocation12]   ;;  %v2652_v54 = vld [vmem:[%s4202_s4 + $0x4] sm:$0xf] }
 0x287   :  { %v2185_v55 = vrot.slane %v2652_v54, %v4108_v48  ;;  %v2193_v39 = vrot.slane %v2652_v54, %v4120_v63  ;;  %v2189_v56 = vrot.slane %v2652_v54, %v4113_v50  ;;  %v2197_v57 = vrot.slane %v2652_v54, %v4123_v0  ;;  %s3986_s16 = smov [#allocation10]  }
 0x288   :  { %s2496_s17 = sshll.u32 %s3986_s16, 4  ;;  %s2497_s17 = int_to_ptr.vmem [resolvable:$true] %s2496_s17 }
 0x289   :  { %s3945_s4 = scalar_lea.vmem %s2497_s17, 1024  ;;  %p3950_p13 = scmp.lt.s32.totalorder %s2497_s17, %s2497_s17 }
 0x28a   :  { %p3946_p12 = scmp.ne.s32.totalorder %s2497_s17, %s3945_s4  ;;  %p3951_p0 = scmp.lt.s32.totalorder %s3945_s4, %s3945_s4 }
 0x28c   :  { %p3952_p1 = por %p3951_p0, %p3950_p13 }
 0x28e   :  { %p3953_p2 = pnand %p3952_p1, %p3946_p12 }
 0x2fa   :  { %v2339_v58 = vpop.f32.mrb[10].mxu0  ;;  %v2481_v59 = vpop.f32.mrb[10].mxu1 }
 0x2fb   :  { %v3169_v60 = vadd.f32 %v2339_v58, %v2185_v55  ;;  %v3171_v61 = vadd.f32 %v2481_v59, %v2193_v39  ;;  %v2341_v62 = vpop.f32.mrb[11].mxu0  ;;  %v2483_v1 = vpop.f32.mrb[11].mxu1 }
 0x2fc   :  { %v3170_v40 = vadd.f32 %v2341_v62, %v2189_v56  ;;  %v3172_v2 = vadd.f32 %v2483_v1, %v2197_v57 }
 0x2fd   :  { %2487 = vst [vmem:[#allocation10 + $0x20] sm:$0xff] %v3169_v60  ;;  %2489 = vst [vmem:[#allocation10 + $0x30] sm:$0xff] %v3171_v61 }
 0x2fe   :  { %2488 = vst [vmem:[#allocation10 + $0x28] sm:$0xff] %v3170_v40  ;;  %2490 = vst [vmem:[#allocation10 + $0x38] sm:$0xff] %v3172_v2 }
 0x2ff   :  { %3956 = shalt.err (!%p3953_p2)
}
 0x300   :  { %s3957_s19 = scalar_lea.hbm %s4203_s5, 1024 }
 0x301   :  { %p3958_p3 = scmp.ne.s32.totalorder %s4203_s5, %s3957_s19  ;;  %p3961_p4 = scmp.lt.u32.totalorder %s3957_s19, %s4203_s5 }
 0x303   :  { %p3963_p5 = pnand %p3961_p4, %p3958_p3 }
 0x305   :  { %3966 = shalt.err (!%p3963_p5)
}
 0x306   :  { %2502 = dma.vmem_to_hbm [thread:$0]  %s2497_s17, 1024, %s4203_s5, [#allocation4], %s3978_s7, %s3978_s7, %s3979_s8  }
 0x307   :  { %3973 = dma.done.wait [#allocation4], 1024  }
 0x308   :  { %3974 = vsyncadd [#allocation4], 4294966272 }
 0x309   :  { %3975 = dma.done.wait [#allocation12], 1024  }
 0x30a   :  { %3976 = vsyncadd [#allocation12], 4294966272 }
 0x30b   :  { %2519 = vsyncpa [#allocation3], 1 }
 0x30c   :  { %2520 = vsyncpa [#allocation6], 1 }
 0x30d   :  { %2521 = vsyncpa [#allocation9], 1 }
 0x30e   :  { %2522 = vsyncpa [#allocation4], 1 }
 0x30f   :  { %2523 = vsyncpa [#allocation12], 1 }

</bundles_post_ra>
